<compile_context>
chip_gen: v7x
topology: tpu7x:2x2x1
jax: 0.10.0
libtpu: 0.0.40
codegen_flags: <defaults>
</compile_context>

<pallas_src>
import jax
import jax.numpy as jnp
from jax.experimental import pallas as pl
from jax.experimental.pallas import tpu as pltpu

D_IN = 28 * 28      # 784
D_HIDDEN = 256
D_OUT = 1
LEAKY_SLOPE = 0.01  # torch.nn.LeakyReLU default negative_slope


def _round_up(n, m):
    return ((n + m - 1) // m) * m


def _leaky_relu(x):
    return jnp.where(x >= 0, x, LEAKY_SLOPE * x)


def d_mlp_kernel(x_ref, w1_ref, b1_ref, w2_ref, b2_ref, w3_ref, b3_ref, o_ref):
    # x streams in as f32 and is cast to bf16 *in-kernel*: no standalone XLA
    # cast/copy in front of the custom call (x path = 4 B/elem HBM, not 8).
    x = x_ref[...].astype(jnp.bfloat16)            # (TB, 784) bf16

    # Hoist bias loads once per tile.
    b1 = b1_ref[...]                               # (1, 256) f32
    b2 = b2_ref[...]                               # (1, 256) f32
    b3 = b3_ref[...]                               # (1, 1)   f32

    # Layer 1: Linear(784 -> 256) + LeakyReLU   (Dropout = identity in eval).
    h1 = jnp.dot(x, w1_ref[...], preferred_element_type=jnp.float32) + b1
    h1 = _leaky_relu(h1)                           # (TB, 256) f32

    # Layer 2: Linear(256 -> 256) + LeakyReLU   (Dropout = identity in eval).
    h2 = jnp.dot(h1.astype(jnp.bfloat16), w2_ref[...],
                 preferred_element_type=jnp.float32) + b2
    h2 = _leaky_relu(h2)                           # (TB, 256) f32

    # Layer 3: Linear(256 -> 1) as a transposed matmul so the logits land
    # lane-dense:  (8, 256) x (TB, 256)^T -> (8, TB), with only row 0 of w3
    # real (rows 1..7 zero-padded).  Extra MXU work is <1% of layers 1+2; in
    # exchange the sigmoid epilogue runs on ~TB/128 vregs instead of TB/8 and
    # the HBM writeback is a contiguous row, not a strided (TB, 1) column.
    s = jax.lax.dot_general(
        w3_ref[...], h2.astype(jnp.bfloat16),
        dimension_numbers=(((1,), (1,)), ((), ())),
        preferred_element_type=jnp.float32)        # (8, TB) f32
    logits = s[0:1, :] + b3                        # (1, TB) f32

    # Sigmoid via EUP exp + approx reciprocal (keeps the epilogue off the VALU).
    o_ref[...] = pl.reciprocal(1.0 + jnp.exp(-logits), approx=True)


def d_forward(x, params, tb=1024):
    """x: (B, 784) float32.  Returns (B, 1) float32 sigmoid scores."""
    w1, b1, w2, b2, w3, b3 = params
    B = x.shape[0]

    # Batch tile: multiple of 128 (lane-dense output blocks, covers bf16
    # sublane packing), aiming for >=2 grid steps so both v7x TensorCores get
    # work (no-op on single-core v5e/v6e); capped by `tb` for VMEM.
    TB = max(128, min(tb, _round_up(-(-B // 2), 128)))
    B_pad = _round_up(B, TB)
    if B_pad != B:
        # Only pads when B is not tile-aligned; pass an aligned batch to skip
        # this extra HBM round-trip entirely.
        x = jnp.pad(x, ((0, B_pad - B), (0, 0)))

    # Weights to bf16 once (tiny, stay VMEM-resident); biases stay f32.
    w1_bf = w1.astype(jnp.bfloat16)                                # (784, 256)
    w2_bf = w2.astype(jnp.bfloat16)                                # (256, 256)
    w3_row = jnp.reshape(w3, (1, D_HIDDEN)).astype(jnp.bfloat16)   # (1, 256)
    w3_pad = jnp.concatenate(
        [w3_row, jnp.zeros((7, D_HIDDEN), jnp.bfloat16)], axis=0)  # (8, 256)
    b1_2d = jnp.reshape(b1, (1, D_HIDDEN)).astype(jnp.float32)
    b2_2d = jnp.reshape(b2, (1, D_HIDDEN)).astype(jnp.float32)
    b3_2d = jnp.reshape(b3, (1, 1)).astype(jnp.float32)

    grid = (B_pad // TB,)

    out = pl.pallas_call(
        d_mlp_kernel,
        out_shape=jax.ShapeDtypeStruct((1, B_pad), jnp.float32),
        grid=grid,
        in_specs=[
            pl.BlockSpec((TB, D_IN), lambda i: (i, 0)),            # x streams
            pl.BlockSpec((D_IN, D_HIDDEN), lambda i: (0, 0)),      # w1 resident
            pl.BlockSpec((1, D_HIDDEN), lambda i: (0, 0)),         # b1 resident
            pl.BlockSpec((D_HIDDEN, D_HIDDEN), lambda i: (0, 0)),  # w2 resident
            pl.BlockSpec((1, D_HIDDEN), lambda i: (0, 0)),         # b2 resident
            pl.BlockSpec((8, D_HIDDEN), lambda i: (0, 0)),         # w3 resident
            pl.BlockSpec((1, 1), lambda i: (0, 0)),                # b3 resident
        ],
        out_specs=pl.BlockSpec((1, TB), lambda i: (0, i)),         # lane-dense
        compiler_params=pltpu.CompilerParams(
            dimension_semantics=("parallel",),
            vmem_limit_bytes=32 * 1024 * 1024),
    )(x, w1_bf, b1_2d, w2_bf, b2_2d, w3_pad, b3_2d)

    return jnp.reshape(out[0, :B], (B, D_OUT))


def init_params(key):
    """Deterministic PyTorch-style init: U(-1/sqrt(fan_in), 1/sqrt(fan_in))."""
    def linear(key, fan_in, fan_out):
        kw, kb = jax.random.split(key)
        bound = 1.0 / jnp.sqrt(fan_in)
        w = jax.random.uniform(kw, (fan_in, fan_out), jnp.float32, -bound, bound)
        b = jax.random.uniform(kb, (1, fan_out), jnp.float32, -bound, bound)
        return w, b

    k1, k2, k3 = jax.random.split(key, 3)
    w1, b1 = linear(k1, D_IN, D_HIDDEN)
    w2, b2 = linear(k2, D_HIDDEN, D_HIDDEN)
    w3, b3 = linear(k3, D_HIDDEN, D_OUT)
    return (w1, b1, w2, b2, w3, b3)


if __name__ == "__main__":
    key = jax.random.PRNGKey(0)
    k_params, k_x = jax.random.split(key)

    params = init_params(k_params)
    B = 200                                              # exercises padding + 2 grid steps
    x = jax.random.normal(k_x, (B, D_IN), jnp.float32)   # flattened fake images

    out = d_forward(x, params)                           # TB=128, grid=(2,)
    out = jax.block_until_ready(out)

    # Reference check in plain JAX (eval-mode dropout = identity), f32 weights.
    w1, b1, w2, b2, w3, b3 = params
    h1 = x @ w1 + b1
    h1 = jnp.where(h1 >= 0, h1, LEAKY_SLOPE * h1)
    h2 = h1 @ w2 + b2
    h2 = jnp.where(h2 >= 0, h2, LEAKY_SLOPE * h2)
    ref = jax.nn.sigmoid(h2 @ w3 + b3)

    assert out.shape == (B, 1)
    # bf16 matmul inputs + approx reciprocal -> loosened tolerance vs pure f32.
    assert jnp.allclose(out, ref, atol=2e-2, rtol=2e-2), (
        float(jnp.max(jnp.abs(out - ref))))

    print("KERNEL_OK")
</pallas_src>

<mosaic_0001>
module attributes {stable_mosaic.version = 11 : i64} {
  func.func @d_mlp_kernel(%arg0: i32, %arg1: memref<128x784xf32, #tpu.memory_space<vmem>>, %arg2: memref<784x256xbf16, #tpu.memory_space<vmem>>, %arg3: memref<1x256xf32, #tpu.memory_space<vmem>>, %arg4: memref<256x256xbf16, #tpu.memory_space<vmem>>, %arg5: memref<1x256xf32, #tpu.memory_space<vmem>>, %arg6: memref<8x256xbf16, #tpu.memory_space<vmem>>, %arg7: memref<1x1xf32, #tpu.memory_space<vmem>>, %arg8: memref<1x128xf32, #tpu.memory_space<vmem>>) attributes {dimension_semantics = [#tpu.dimension_semantics<parallel>], iteration_bounds = array<i64: 2>, scalar_prefetch = 0 : i64, scratch_operands = 0 : i64, tpu.core_type = #tpu.core_type<tc>, window_params = [{transform_indices = @transform_0, window_bounds = array<i64: 128, 784>}, {pipeline_mode = #tpu.pipeline_mode<synchronous>, transform_indices = @transform_1, window_bounds = array<i64: 784, 256>}, {pipeline_mode = #tpu.pipeline_mode<synchronous>, transform_indices = @transform_2, window_bounds = array<i64: 1, 256>}, {pipeline_mode = #tpu.pipeline_mode<synchronous>, transform_indices = @transform_3, window_bounds = array<i64: 256, 256>}, {pipeline_mode = #tpu.pipeline_mode<synchronous>, transform_indices = @transform_4, window_bounds = array<i64: 1, 256>}, {pipeline_mode = #tpu.pipeline_mode<synchronous>, transform_indices = @transform_5, window_bounds = array<i64: 8, 256>}, {pipeline_mode = #tpu.pipeline_mode<synchronous>, transform_indices = @transform_6, window_bounds = array<i64: 1, 1>}, {transform_indices = @transform_7, window_bounds = array<i64: 1, 128>}]} {
    %c0 = arith.constant 0 : index
    %c0_0 = arith.constant 0 : index
    %0 = vector.load %arg1[%c0, %c0_0] : memref<128x784xf32, #tpu.memory_space<vmem>>, vector<128x784xf32>
    %1 = arith.truncf %0 : vector<128x784xf32> to vector<128x784xbf16>
    %c0_1 = arith.constant 0 : index
    %c0_2 = arith.constant 0 : index
    %2 = vector.load %arg3[%c0_1, %c0_2] : memref<1x256xf32, #tpu.memory_space<vmem>>, vector<1x256xf32>
    %c0_3 = arith.constant 0 : index
    %c0_4 = arith.constant 0 : index
    %3 = vector.load %arg5[%c0_3, %c0_4] : memref<1x256xf32, #tpu.memory_space<vmem>>, vector<1x256xf32>
    %c0_5 = arith.constant 0 : index
    %c0_6 = arith.constant 0 : index
    %4 = vector.load %arg7[%c0_5, %c0_6] : memref<1x1xf32, #tpu.memory_space<vmem>>, vector<1x1xf32>
    %c0_7 = arith.constant 0 : index
    %c0_8 = arith.constant 0 : index
    %5 = vector.load %arg2[%c0_7, %c0_8] : memref<784x256xbf16, #tpu.memory_space<vmem>>, vector<784x256xbf16>
    %cst = arith.constant dense<0.000000e+00> : vector<128x256xf32>
    %6 = tpu.matmul %1, %5, %cst {dimension_numbers = #tpu.dot_dimension_numbers<[1], [0], [0], [1], [0, 0, 1, 1], [], []>} : vector<128x784xbf16>, vector<784x256xbf16>, vector<128x256xf32> -> vector<128x256xf32>
    %7 = vector.broadcast %2 : vector<1x256xf32> to vector<128x256xf32>
    %8 = arith.addf %6, %7 : vector<128x256xf32>
    %cst_9 = arith.constant 0.000000e+00 : f32
    %9 = vector.broadcast %cst_9 : f32 to vector<128x256xf32>
    %10 = arith.cmpf oge, %8, %9 : vector<128x256xf32>
    %cst_10 = arith.constant 0.00999999977 : f32
    %11 = vector.broadcast %cst_10 : f32 to vector<128x256xf32>
    %12 = arith.mulf %11, %8 : vector<128x256xf32>
    %13 = arith.select %10, %8, %12 : vector<128x256xi1>, vector<128x256xf32>
    %14 = arith.truncf %13 : vector<128x256xf32> to vector<128x256xbf16>
    %c0_11 = arith.constant 0 : index
    %c0_12 = arith.constant 0 : index
    %15 = vector.load %arg4[%c0_11, %c0_12] : memref<256x256xbf16, #tpu.memory_space<vmem>>, vector<256x256xbf16>
    %cst_13 = arith.constant dense<0.000000e+00> : vector<128x256xf32>
    %16 = tpu.matmul %14, %15, %cst_13 {dimension_numbers = #tpu.dot_dimension_numbers<[1], [0], [0], [1], [0, 0, 1, 1], [], []>} : vector<128x256xbf16>, vector<256x256xbf16>, vector<128x256xf32> -> vector<128x256xf32>
    %17 = vector.broadcast %3 : vector<1x256xf32> to vector<128x256xf32>
    %18 = arith.addf %16, %17 : vector<128x256xf32>
    %cst_14 = arith.constant 0.000000e+00 : f32
    %19 = vector.broadcast %cst_14 : f32 to vector<128x256xf32>
    %20 = arith.cmpf oge, %18, %19 : vector<128x256xf32>
    %cst_15 = arith.constant 0.00999999977 : f32
    %21 = vector.broadcast %cst_15 : f32 to vector<128x256xf32>
    %22 = arith.mulf %21, %18 : vector<128x256xf32>
    %23 = arith.select %20, %18, %22 : vector<128x256xi1>, vector<128x256xf32>
    %c0_16 = arith.constant 0 : index
    %c0_17 = arith.constant 0 : index
    %24 = vector.load %arg6[%c0_16, %c0_17] : memref<8x256xbf16, #tpu.memory_space<vmem>>, vector<8x256xbf16>
    %25 = arith.truncf %23 : vector<128x256xf32> to vector<128x256xbf16>
    %cst_18 = arith.constant dense<0.000000e+00> : vector<8x128xf32>
    %26 = tpu.matmul %24, %25, %cst_18 {dimension_numbers = #tpu.dot_dimension_numbers<[1], [1], [0], [0], [0, 0, 1, 0], [], []>} : vector<8x256xbf16>, vector<128x256xbf16>, vector<8x128xf32> -> vector<8x128xf32>
    %27 = vector.extract_strided_slice %26 {offsets = [0, 0], sizes = [1, 128], strides = [1, 1]} : vector<8x128xf32> to vector<1x128xf32>
    %28 = vector.broadcast %4 : vector<1x1xf32> to vector<1x128xf32>
    %29 = arith.addf %27, %28 : vector<1x128xf32>
    %cst_19 = arith.constant 0.000000e+00 : f32
    %30 = vector.broadcast %cst_19 : f32 to vector<1x128xf32>
    %31 = arith.subf %30, %29 : vector<1x128xf32>
    %32 = math.exp %31 : vector<1x128xf32>
    %cst_20 = arith.constant 1.000000e+00 : f32
    %33 = vector.broadcast %cst_20 : f32 to vector<1x128xf32>
    %34 = arith.addf %33, %32 : vector<1x128xf32>
    %35 = tpu.reciprocal %34 {approx = true} : vector<1x128xf32> -> vector<1x128xf32>
    %c0_21 = arith.constant 0 : index
    %c0_22 = arith.constant 0 : index
    %36 = vector.load %arg8[%c0_21, %c0_22] : memref<1x128xf32, #tpu.memory_space<vmem>>, vector<1x128xf32>
    tpu.vector_store %arg8[%c0_21, %c0_22], %35 {strides = array<i32>} : memref<1x128xf32, #tpu.memory_space<vmem>>, vector<1x128xf32>,
    return
  }
  func.func @transform_0(%arg0: i32) -> (i32, i32) {
    %c0_i32 = arith.constant 0 : i32
    %c0_i32_0 = arith.constant 0 : i32
    return %arg0, %c0_i32 : i32, i32
  }
  func.func @transform_1(%arg0: i32) -> (i32, i32) {
    %c0_i32 = arith.constant 0 : i32
    %c0_i32_0 = arith.constant 0 : i32
    %c0_i32_1 = arith.constant 0 : i32
    return %c0_i32, %c0_i32_0 : i32, i32
  }
  func.func @transform_2(%arg0: i32) -> (i32, i32) {
    %c0_i32 = arith.constant 0 : i32
    %c0_i32_0 = arith.constant 0 : i32
    %c0_i32_1 = arith.constant 0 : i32
    return %c0_i32, %c0_i32_0 : i32, i32
  }
  func.func @transform_3(%arg0: i32) -> (i32, i32) {
    %c0_i32 = arith.constant 0 : i32
    %c0_i32_0 = arith.constant 0 : i32
    %c0_i32_1 = arith.constant 0 : i32
    return %c0_i32, %c0_i32_0 : i32, i32
  }
  func.func @transform_4(%arg0: i32) -> (i32, i32) {
    %c0_i32 = arith.constant 0 : i32
    %c0_i32_0 = arith.constant 0 : i32
    %c0_i32_1 = arith.constant 0 : i32
    return %c0_i32, %c0_i32_0 : i32, i32
  }
  func.func @transform_5(%arg0: i32) -> (i32, i32) {
    %c0_i32 = arith.constant 0 : i32
    %c0_i32_0 = arith.constant 0 : i32
    %c0_i32_1 = arith.constant 0 : i32
    return %c0_i32, %c0_i32_0 : i32, i32
  }
  func.func @transform_6(%arg0: i32) -> (i32, i32) {
    %c0_i32 = arith.constant 0 : i32
    %c0_i32_0 = arith.constant 0 : i32
    %c0_i32_1 = arith.constant 0 : i32
    return %c0_i32, %c0_i32_0 : i32, i32
  }
  func.func @transform_7(%arg0: i32) -> (i32, i32) {
    %c0_i32 = arith.constant 0 : i32
    %c0_i32_0 = arith.constant 0 : i32
    return %c0_i32, %arg0 : i32, i32
  }
}

</mosaic_0001>

<bundles_post_ra>
// kernel: tpu_custom_call.1
= control target key start
LH: loop header
LB: loop body
LE: loop exit
PB: predicated region body
PF: predicated region fallthrough
CT: control target
= control target key end

     0   :  { %s3627_s0 = inlined_call_operand.vmem [shape: f32[256,784], index: 0, kind: input, shape index: {}]   ;;  %s3628_s1 = inlined_call_operand.vmem [shape: bf16[784,256], index: 1, kind: input, shape index: {}]   ;;  %s3629_s2 = inlined_call_operand.vmem [shape: f32[1,256], index: 2, kind: input, shape index: {}]   ;;  %s3630_s3 = inlined_call_operand.vmem [shape: bf16[256,256], index: 3, kind: input, shape index: {}]   ;;  %s3631_s4 = inlined_call_operand.vmem [shape: f32[1,256], index: 4, kind: input, shape index: {}]   ;;  %s3632_s5 = inlined_call_operand.vmem [shape: bf16[8,256], index: 5, kind: input, shape index: {}]   ;;  %s3633_s6 = inlined_call_operand.<no memory space> [shape: f32[1,1], index: 6, kind: input, shape index: {}]   ;;  %s3634_s7 = inlined_call_operand.hbm [shape: f32[1,256], index: 7, kind: output, shape index: {}]  }
   0x1   :  { %v12_v0 = vstv %s3633_s6 }
   0x2   :  { %13 = vst [vmem:[#allocation2] sm:$0x1] %v12_v0 }
   0x3   :  { %14 = vsyncpa [#allocation4], 0 }
   0x4   :  { %16 = vsyncpa [#allocation4 + $0x1], 0  ;;  %s2832_s26 = smov 0   ;;  %s2834_s27 = smov 0  }
   0x5   :  { %s2836_s28 = smov 0   ;;  %s2838_s29 = smov 0  }
   0x6 LB: > { %s2202_s6 = sadd.s32 4294967295, %s2785_s29   ;;  %s2203_s30 = sadd.s32 4294967294, %s2785_s29   ;;  %s2785_s29 = sphi %s2838_s29, %s3640_s29   ;;  %s2781_s28 = sphi %s2836_s28, %s3639_s28   ;;  %s2777_s27 = sphi %s2834_s27, %s3638_s27   ;;  %s2773_s26 = sphi %s2832_s26, %s3637_s26  }
   0x7   : > { %s2855_s8 = sadd.s32 1, %s2785_s29   ;;  %s181_s9 = sadd.s32 1, %s2781_s28 }
   0x8   : > { %s178_s10 = ssub.s32 %s2785_s29, %s2855_s8  ;;  %p191_p0 = scmp.ne.s32.totalorder %s2781_s28, %s2777_s27 }
   0x9   : > { %p179_p1 = scmp.eq.s32.totalorder %s178_s10, 0  ;;  %p192_p2 = scmp.eq.s32.totalorder %s2202_s6, 1 }
   0xa   : > { %p197_p3 = scmp.ne.s32.totalorder %s2777_s27, %s2773_s26  ;;  %p198_p4 = scmp.eq.s32.totalorder %s2203_s30, 1 }
   0xb   : > { %s2865_s11 = scalar_select %p179_p1, %s2781_s28, %s181_s9  }
   0xc   : > { %p2867_p5 = por %p192_p2, %p191_p0  ;;  %p2871_p6 = por %p198_p4, %p197_p3 }
   0xd   : > { %p2206_p7 = scmp.ge.s32.totalorder %s2785_s29, 1  ;;  %p244_p8 = scmp.lt.s32.totalorder %s2785_s29, 3 }
   0xf   : > { %p245_p9 = pnand %p2206_p7, %p244_p8 }
  0x10   : > { %v2522_v1 = vld [vmem:[%s3628_s1 + $0x104] ss:$8 sps:$4 sm:$0xff] (!%p245_p9)   ;;  %v2524_v2 = vld [vmem:[%s3628_s1 + $0x100] ss:$8 sps:$4 sm:$0xff] (!%p245_p9)   ;;  %v2525_v3 = vld [vmem:[%s3628_s1 + $0x114] ss:$8 sps:$4 sm:$0xff] (!%p245_p9)  }
  0x11   : > { %248 = sbr.rel (%p245_p9) target bundleno = 974 (0x3ce), region = 48  ;;  %1192 = vmatprep.subr.bf16.mxu0 (!%p245_p9), %v2522_v1  ;;  %v2527_v4 = vld [vmem:[%s3628_s1 + $0x110] ss:$8 sps:$4 sm:$0xff] (!%p245_p9)   ;;  %s2889_s22 = sshll.u32 (!%p245_p9), %s2202_s6, 4  ;;  %v2528_v5 = vld [vmem:[%s3628_s1 + $0x124] ss:$8 sps:$4 sm:$0xff] (!%p245_p9)  }
  0x12   : > { %1193 = vmatpush1.bf16.msra.mxu0 (!%p245_p9), %v2524_v2  ;;  %p277_p10 = scmp.lt.s32.totalorder (!%p245_p9), %s2889_s22, 31  ;;  %v2530_v6 = vld [vmem:[%s3628_s1 + $0x120] ss:$8 sps:$4 sm:$0xff] (!%p245_p9)   ;;  %v2531_v7 = vld [vmem:[%s3628_s1 + $0x134] ss:$8 sps:$4 sm:$0xff] (!%p245_p9)   ;;  %v2787_v48 = vmov (!%p245_p9), 0  }
  0x13   : > { %1194 = vmatprep.subr.bf16.mxu0 (!%p245_p9), %v2525_v3  ;;  %v2533_v8 = vld [vmem:[%s3628_s1 + $0x130] ss:$8 sps:$4 sm:$0xff] (!%p245_p9)   ;;  %v2534_v9 = vld [vmem:[%s3628_s1 + $0x144] ss:$8 sps:$4 sm:$0xff] (!%p245_p9)   ;;  %v2536_v10 = vld [vmem:[%s3628_s1 + $0x140] ss:$8 sps:$4 sm:$0xff] (!%p245_p9)   ;;  %2521 = vset.pattern.permute.xlu0 (!%p245_p9), %v2787_v48 }
  0x14   : > { %v2537_v11 = vld [vmem:[%s3628_s1 + $0x154] ss:$8 sps:$4 sm:$0xff] (!%p245_p9)   ;;  %v2539_v12 = vld [vmem:[%s3628_s1 + $0x150] ss:$8 sps:$4 sm:$0xff] (!%p245_p9)   ;;  %v2540_v13 = vld [vmem:[%s3628_s1 + $0x164] ss:$8 sps:$4 sm:$0xff] (!%p245_p9)  }
  0x15   : > { %v2542_v17 = vld [vmem:[%s3628_s1 + $0x160] ss:$8 sps:$4 sm:$0xff] (!%p245_p9)   ;;  %v2543_v18 = vld [vmem:[%s3628_s1 + $0x174] ss:$8 sps:$4 sm:$0xff] (!%p245_p9)   ;;  %v2545_v19 = vld [vmem:[%s3628_s1 + $0x170] ss:$8 sps:$4 sm:$0xff] (!%p245_p9)  }
  0x16   : > { %1195 = vmatpush1.bf16.msra.mxu0 (!%p245_p9), %v2527_v4  ;;  %v2546_v20 = vld [vmem:[%s3628_s1 + $0x184] ss:$8 sps:$4 sm:$0xff] (!%p245_p9)   ;;  %v2548_v21 = vld [vmem:[%s3628_s1 + $0x180] ss:$8 sps:$4 sm:$0xff] (!%p245_p9)   ;;  %v2549_v22 = vld [vmem:[%s3628_s1 + $0x194] ss:$8 sps:$4 sm:$0xff] (!%p245_p9)  }
  0x17   : > { %1196 = vmatprep.subr.bf16.mxu0 (!%p245_p9), %v2528_v5  ;;  %v2551_v23 = vld [vmem:[%s3628_s1 + $0x190] ss:$8 sps:$4 sm:$0xff] (!%p245_p9)   ;;  %v2552_v24 = vld [vmem:[%s3628_s1 + $0x1a4] ss:$8 sps:$4 sm:$0xff] (!%p245_p9)   ;;  %v2554_v25 = vld [vmem:[%s3628_s1 + $0x1a0] ss:$8 sps:$4 sm:$0xff] (!%p245_p9)  }
  0x18   : > { %s278_s6 = scalar_select %p277_p10, %s2889_s22, 31  ;;  %v2555_v26 = vld [vmem:[%s3628_s1 + $0x1b4] ss:$8 sps:$4 sm:$0xff]   ;;  %v2557_v27 = vld [vmem:[%s3628_s1 + $0x1b0] ss:$8 sps:$4 sm:$0xff]   ;;  %vm1054_vm0 = vcmask 130048  }
  0x19   : > { %v2558_v28 = vld [vmem:[%s3628_s1 + $0x1c4] ss:$8 sps:$4 sm:$0xff]   ;;  %v2560_v29 = vld [vmem:[%s3628_s1 + $0x1c0] ss:$8 sps:$4 sm:$0xff]   ;;  %v2561_v30 = vld [vmem:[%s3628_s1 + $0x1d4] ss:$8 sps:$4 sm:$0xff]  }
  0x1a   : > { %1197 = vmatpush1.bf16.msra.mxu0 %v2530_v6  ;;  %s2480_s18 = smul.u32 56, %s278_s6  ;;  %v2563_v31 = vld [vmem:[%s3628_s1 + $0x1d0] ss:$8 sps:$4 sm:$0xff]   ;;  %v2564_v32 = vld [vmem:[%s3628_s1 + $0x1e4] ss:$8 sps:$4 sm:$0xff]   ;;  %s274_s16 = sand.u32 1, %s2777_s27  }
  0x1b   : > { %1198 = vmatprep.subr.bf16.mxu0 %v2531_v7  ;;  %v2615_v33 = vld [vmem:[%s3628_s1 + $0x4] ss:$8 sps:$4 sm:$0xff]   ;;  %v2617_v34 = vld [vmem:[%s3628_s1] ss:$8 sps:$4 sm:$0xff]   ;;  %v2621_v36 = vld [vmem:[%s3628_s1 + $0x14] ss:$8 sps:$4 sm:$0xff]  }
  0x1c   : > { %s2917_s30 = scalar_lea.vmem %s3627_s0, %s2480_s18  ;;  %1079 = vmatprep.subr.bf16.mxu1 %v2615_v33  ;;  %v2566_v35 = vld [vmem:[%s3628_s1 + $0x1e0] ss:$8 sps:$4 sm:$0xff]   ;;  %v2567_v37 = vld [vmem:[%s3628_s1 + $0x1f4] ss:$8 sps:$4 sm:$0xff]   ;;  %v2623_v38 = vld [vmem:[%s3628_s1 + $0x10] ss:$8 sps:$4 sm:$0xff]  }
  0x1d   : > { %v287_v14 = vld [vmem:[%s2917_s30 + $0x18] sm:$0xff]  ;;  %v294_v15 = vld [vmem:[%s2917_s30 + $0x50] sm:$0xff]  ;;  %1080 = vmatpush1.bf16.msra.mxu1 %v2617_v34  ;;  %v293_v41 = vld [vmem:[%s2917_s30 + $0x48] sm:$0xff]  ;;  %s275_s17 = scalar_lea.vmem [#allocation3], %s274_s16  ;;  %s2136_s21 = scalar_lea.sflag [#allocation4], %s274_s16 }
  0x1e   : > { %1199 = vmatpush1.bf16.msra.mxu0 %v2533_v8  ;;  %v399_v16 = vpack.c.bf16 %v294_v15, %v287_v14  ;;  %v2569_v39 = vld [vmem:[%s3628_s1 + $0x1f0] ss:$8 sps:$4 sm:$0xff]   ;;  %1081 = vmatprep.subr.bf16.mxu1 %v2621_v36  ;;  %v2572_v42 = vld [vmem:[%s3628_s1 + $0x204] ss:$8 sps:$4 sm:$0xff]   ;;  %v2629_v46 = vld [vmem:[%s3628_s1 + $0x20] ss:$8 sps:$4 sm:$0xff]  }
  0x1f   : > { %1200 = vmatprep.subr.bf16.mxu0 %v2534_v9  ;;  %v286_v40 = vld [vmem:[%s2917_s30 + $0x10] sm:$0xff]  ;;  %v301_v43 = vld [vmem:[%s2917_s30 + $0x88] sm:$0xff]  ;;  %v308_v44 = vld [vmem:[%s2917_s30 + $0xc0] sm:$0xff]  ;;  %s2148_s18 = sshll.u32 %s275_s17, 4  ;;  %s2788_s24 = smov [#allocation3]   ;;  %s3587_s18 = int_to_ptr.vmem [resolvable:$true] %s2148_s18 }
  0x20   : > { %1224 = vmatprep.mubr.bf16.mxu0 %v399_v16  ;;  %v2627_v45 = vld [vmem:[%s3628_s1 + $0x24] ss:$8 sps:$4 sm:$0xff]   ;;  %v2630_v47 = vld [vmem:[%s3628_s1 + $0x34] ss:$8 sps:$4 sm:$0xff]   ;;  %v398_v49 = vpack.c.bf16 %v293_v41, %v286_v40  ;;  %v2570_v50 = vld [vmem:[%s3628_s1 + $0x200] ss:$8 sps:$4 sm:$0xff]   ;;  %v406_v52 = vpack.c.bf16 %v308_v44, %v301_v43 }
  0x21   : > { %1082 = vmatpush1.bf16.msra.mxu1 %v2623_v38  ;;  %v2575_v51 = vld [vmem:[%s3628_s1 + $0x214] ss:$8 sps:$4 sm:$0xff]   ;;  %v2632_v53 = vld [vmem:[%s3628_s1 + $0x30] ss:$8 sps:$4 sm:$0xff]   ;;  %v300_v55 = vld [vmem:[%s2917_s30 + $0x80] sm:$0xff]  ;;  %s2723_s23 = scalar_lea.vmem %s3587_s18, 16 }
  0x22   : > { %1201 = vmatpush1.bf16.msra.mxu0 %v2536_v10  ;;  %1083 = vmatprep.subr.bf16.mxu1 %v2627_v45  ;;  %v2573_v54 = vld [vmem:[%s3628_s1 + $0x210] ss:$8 sps:$4 sm:$0xff]   ;;  %v2633_v56 = vld [vmem:[%s3628_s1 + $0x44] ss:$8 sps:$4 sm:$0xff]   ;;  %v2635_v61 = vld [vmem:[%s3628_s1 + $0x40] ss:$8 sps:$4 sm:$0xff]   ;;  %p2724_p11 = scmp.ne.s32.totalorder %s3587_s18, %s2723_s23 }
  0x23   : > { %1202 = vmatprep.subr.bf16.mxu0 %v2537_v11  ;;  %v307_v57 = vld [vmem:[%s2917_s30 + $0xb8] sm:$0xff]  ;;  %v2578_v58 = vld [vmem:[%s3628_s1 + $0x224] ss:$8 sps:$4 sm:$0xff]   ;;  %v322_v60 = vld [vmem:[%s2917_s30 + $0x130] sm:$0xff]  ;;  %s2727_s25 = sshll.u32 %s2788_s24, 4  ;;  %s2728_s25 = int_to_ptr.vmem [resolvable:$false] %s2727_s25 }
  0x24   : > { %v315_v59 = vld [vmem:[%s2917_s30 + $0xf8] sm:$0xff]  ;;  %v405_v63 = vpack.c.bf16 %v307_v57, %v300_v55  ;;  %v2576_v0 = vld [vmem:[%s3628_s1 + $0x220] ss:$8 sps:$4 sm:$0xff]   ;;  %v314_v5 = vld [vmem:[%s2917_s30 + $0xf0] sm:$0xff]  ;;  %p2725_p12 = pnand %p2724_p11, %p2867_p5  ;;  %s2729_s9 = scalar_lea.vmem %s2728_s25, 32 }
  0x25   : > { %1084 = vmatpush1.bf16.msra.mxu1 %v2629_v46  ;;  %v2636_v62 = vld [vmem:[%s3628_s1 + $0x54] ss:$8 sps:$4 sm:$0xff]   ;;  %v413_v2 = vpack.c.bf16 %v322_v60, %v315_v59  ;;  %v2638_v3 = vld [vmem:[%s3628_s1 + $0x50] ss:$8 sps:$4 sm:$0xff]   ;;  %v2639_v6 = vld [vmem:[%s3628_s1 + $0x64] ss:$8 sps:$4 sm:$0xff]   ;;  %p2730_p0 = scmp.lt.s32.totalorder %s3587_s18, %s2728_s25  ;;  %p2731_p1 = scmp.lt.s32.totalorder %s2729_s9, %s2723_s23 }
  0x26   : > { %1203 = vmatpush1.bf16.msra.mxu0 %v2539_v12  ;;  %1085 = vmatprep.subr.bf16.mxu1 %v2630_v47  ;;  %v2581_v1 = vld [vmem:[%s3628_s1 + $0x234] ss:$8 sps:$4 sm:$0xff]   ;;  %v2579_v4 = vld [vmem:[%s3628_s1 + $0x230] ss:$8 sps:$4 sm:$0xff]   ;;  %v321_v7 = vld [vmem:[%s2917_s30 + $0x128] sm:$0xff]  ;;  %p2726_p13 = pneg %p2725_p12 }
  0x27   : > { %1204 = vmatprep.subr.bf16.mxu0 %v2540_v13  ;;  %v2584_v8 = vld [vmem:[%s3628_s1 + $0x244] ss:$8 sps:$4 sm:$0xff]   ;;  %v2641_v11 = vld [vmem:[%s3628_s1 + $0x60] ss:$8 sps:$4 sm:$0xff]   ;;  %v2642_v12 = vld [vmem:[%s3628_s1 + $0x74] ss:$8 sps:$4 sm:$0xff]   ;;  %v412_v13 = vpack.c.bf16 %v321_v7, %v314_v5  ;;  %p2732_p2 = por %p2731_p1, %p2730_p0 }
  0x28   : > { %v329_v9 = vld [vmem:[%s2917_s30 + $0x168] sm:$0xff]  ;;  %v336_v10 = vld [vmem:[%s2917_s30 + $0x1a0] sm:$0xff]  ;;  %v2587_v15 = vld [vmem:[%s3628_s1 + $0x254] ss:$8 sps:$4 sm:$0xff]  }
  0x29   : > { %1086 = vmatpush1.bf16.msra.mxu1 %v2632_v53  ;;  %v2582_v14 = vld [vmem:[%s3628_s1 + $0x240] ss:$8 sps:$4 sm:$0xff]   ;;  %v420_v16 = vpack.c.bf16 %v336_v10, %v329_v9  ;;  %v2650_v33 = vld [vmem:[%s3628_s1 + $0x90] ss:$8 sps:$4 sm:$0xff]   ;;  %v2654_v43 = vld [vmem:[%s3628_s1 + $0xb4] ss:$8 sps:$4 sm:$0xff]   ;;  %p2733_p3 = pnand %p2732_p2, %p2726_p13 }
  0x2a   : > { %1205 = vmatpush1.bf16.msra.mxu0 %v2542_v17  ;;  %1087 = vmatprep.subr.bf16.mxu1 %v2633_v56  ;;  %v2644_v17 = vld [vmem:[%s3628_s1 + $0x70] ss:$8 sps:$4 sm:$0xff]   ;;  %v349_v38 = vld [vmem:[%s2917_s30 + $0x208] sm:$0xff]  ;;  %v364_v41 = vld [vmem:[%s2917_s30 + $0x280] sm:$0xff] }
  0x2b   : > { %1206 = vmatprep.subr.bf16.mxu0 %v2543_v18  ;;  %v2585_v18 = vld [vmem:[%s3628_s1 + $0x250] ss:$8 sps:$4 sm:$0xff]   ;;  %v357_v40 = vld [vmem:[%s2917_s30 + $0x248] sm:$0xff]  ;;  %v2599_v47 = vld [vmem:[%s3628_s1 + $0x294] ss:$8 sps:$4 sm:$0xff]  }
  0x2c   : > { %v2591_v36 = vld [vmem:[%s3628_s1 + $0x270] ss:$8 sps:$4 sm:$0xff]   ;;  %v2594_v45 = vld [vmem:[%s3628_s1 + $0x280] ss:$8 sps:$4 sm:$0xff]   ;;  %v434_v46 = vpack.c.bf16 %v364_v41, %v357_v40  ;;  %v2657_v53 = vld [vmem:[%s3628_s1 + $0xc4] ss:$8 sps:$4 sm:$0xff]  }
  0x2d   : > { %1088 = vmatpush1.bf16.msra.mxu1 %v2635_v61  ;;  %v371_v55 = vld [vmem:[%s2917_s30 + $0x2b8] sm:$0xff]  ;;  %v378_v56 = vld [vmem:[%s2917_s30 + $0x2f0] sm:$0xff]  ;;  %v2659_v57 = vld [vmem:[%s3628_s1 + $0xc0] ss:$8 sps:$4 sm:$0xff]  }
  0x2e   : > { %1207 = vmatpush1.bf16.msra.mxu0 %v2545_v19  ;;  %1089 = vmatprep.subr.bf16.mxu1 %v2636_v62  ;;  %v328_v19 = vld [vmem:[%s2917_s30 + $0x160] sm:$0xff]  ;;  %v2605_v61 = vld [vmem:[%s3628_s1 + $0x2b4] ss:$8 sps:$4 sm:$0xff]   ;;  %v2662_v62 = vld [vmem:[%s3628_s1 + $0xd0] ss:$8 sps:$4 sm:$0xff]  }
  0x2f   : > { %1208 = vmatprep.subr.bf16.mxu0 %v2546_v20  ;;  %v2645_v20 = vld [vmem:[%s3628_s1 + $0x84] ss:$8 sps:$4 sm:$0xff]   ;;  %v2600_v59 = vld [vmem:[%s3628_s1 + $0x2a0] ss:$8 sps:$4 sm:$0xff]   ;;  %v2674_v40 = vld [vmem:[%s3630_s3 + $0x14] ss:$8 sps:$4 sm:$0xff]  }
  0x30   : > { %v385_v5 = vld [vmem:[%s2917_s30 + $0x328] sm:$0xff] }
  0x31   : > { %1090 = vmatpush1.bf16.msra.mxu1 %v2638_v3  ;;  %v2663_v3 = vld [vmem:[%s3628_s1 + $0xe4] ss:$8 sps:$4 sm:$0xff]   ;;  %v2665_v7 = vld [vmem:[%s3628_s1 + $0xe0] ss:$8 sps:$4 sm:$0xff]  }
  0x32   : > { %1209 = vmatpush1.bf16.msra.mxu0 %v2548_v21  ;;  %1091 = vmatprep.subr.bf16.mxu1 %v2639_v6  ;;  %v335_v21 = vld [vmem:[%s2917_s30 + $0x198] sm:$0xff]  ;;  %v392_v6 = vld [vmem:[%s2917_s30 + $0x360] sm:$0xff] }
  0x33   : > { %1210 = vmatprep.subr.bf16.mxu0 %v2549_v22  ;;  %v2590_v22 = vld [vmem:[%s3628_s1 + $0x264] ss:$8 sps:$4 sm:$0xff]   ;;  %v2606_v10 = vld [vmem:[%s3628_s1 + $0x2c0] ss:$8 sps:$4 sm:$0xff]  }
  0x34   : > { %v2626_v41 = vld [vmem:[%s3628_s1 + $0x304] ss:$8 sps:$4 sm:$0xff]  }
  0x35   : > { %1092 = vmatpush1.bf16.msra.mxu1 %v2641_v11  ;;  %v2611_v11 = vld [vmem:[%s3628_s1 + $0x2d4] ss:$8 sps:$4 sm:$0xff]  }
  0x36   : > { %1211 = vmatpush1.bf16.msra.mxu0 %v2551_v23  ;;  %1093 = vmatprep.subr.bf16.mxu1 %v2642_v12  ;;  %v343_v23 = vld [vmem:[%s2917_s30 + $0x1d8] sm:$0xff]  ;;  %v448_v12 = vpack.c.bf16 %v392_v6, %v385_v5  ;;  %v341_v5 = vld [vmem:[%s2917_s30 + $0x1c8] sm:$0xff]  ;;  %v348_v6 = vld [vmem:[%s2917_s30 + $0x200] sm:$0xff] }
  0x37   : > { %1212 = vmatprep.subr.bf16.mxu0 %v2552_v24  ;;  %v350_v24 = vld [vmem:[%s2917_s30 + $0x210] sm:$0xff] }
  0x39   : > { %1094 = vmatpush1.bf16.msra.mxu1 %v2644_v17  ;;  %v306_v17 = vld [vmem:[%s2917_s30 + $0xb0] sm:$0xff] }
  0x3a   : > { %1213 = vmatpush1.bf16.msra.mxu0 %v2554_v25  ;;  %v2647_v25 = vld [vmem:[%s3628_s1 + $0x80] ss:$8 sps:$4 sm:$0xff]   ;;  %1095 = vmatprep.subr.bf16.mxu1 %v2645_v20  ;;  %v391_v20 = vld [vmem:[%s2917_s30 + $0x358] sm:$0xff] }
  0x3b   : > { %1214 = vmatprep.subr.bf16.mxu0 %v2555_v26  ;;  %v2648_v26 = vld [vmem:[%s3628_s1 + $0x94] ss:$8 sps:$4 sm:$0xff]  }
  0x3d   : > { %1096 = vmatpush1.bf16.msra.mxu1 %v2647_v25 }
  0x3e   : > { %1215 = vmatpush1.bf16.msra.mxu0 %v2557_v27  ;;  %v419_v27 = vpack.c.bf16 %v335_v21, %v328_v19  ;;  %1097 = vmatprep.subr.bf16.mxu1 %v2648_v26  ;;  %v384_v19 = vld [vmem:[%s2917_s30 + $0x320] sm:$0xff] }
  0x3f   : > { %1216 = vmatprep.subr.bf16.mxu0 %v2558_v28  ;;  %v285_v28 = vld [vmem:[%s2917_s30 + $0x8] sm:$0xff]  ;;  %v447_v26 = vpack.c.bf16 %v391_v20, %v384_v19  ;;  %v340_v19 = vld [vmem:[%s2917_s30 + $0x1c0] sm:$0xff]  ;;  %v347_v20 = vld [vmem:[%s2917_s30 + $0x1f8] sm:$0xff] }
  0x41   : > { %1098 = vmatpush1.bf16.msra.mxu1 %v2650_v33  ;;  %v320_v33 = vld [vmem:[%s2917_s30 + $0x120] sm:$0xff] }
  0x42   : > { %1217 = vmatpush1.bf16.msra.mxu0 %v2560_v29  ;;  %v2588_v29 = vld [vmem:[%s3628_s1 + $0x260] ss:$8 sps:$4 sm:$0xff]  }
  0x43   : > { %1218 = vmatprep.subr.bf16.mxu0 %v2561_v30  ;;  %v427_v30 = vpack.c.bf16 %v350_v24, %v343_v23  ;;  %v289_v23 = vld [vmem:[%s2917_s30 + $0x28] sm:$0xff]  ;;  %v296_v24 = vld [vmem:[%s2917_s30 + $0x60] sm:$0xff] }
  0x46   : > { %1219 = vmatpush1.bf16.msra.mxu0 %v2563_v31  ;;  %v292_v31 = vld [vmem:[%s2917_s30 + $0x40] sm:$0xff] }
  0x47   : > { %1220 = vmatprep.subr.bf16.mxu0 %v2564_v32  ;;  %v2593_v32 = vld [vmem:[%s3628_s1 + $0x274] ss:$8 sps:$4 sm:$0xff]   ;;  %v397_v34 = vpack.c.bf16 %v292_v31, %v285_v28  ;;  %v401_v28 = vpack.c.bf16 %v296_v24, %v289_v23  ;;  %v305_v31 = vld [vmem:[%s2917_s30 + $0xa8] sm:$0xff] }
  0x48   : > { %v2687_v23 = vld [vmem:[%s3630_s3 + $0x60] ss:$8 sps:$4 sm:$0xff]   ;;  %v2692_v24 = vld [vmem:[%s3630_s3 + $0x74] ss:$8 sps:$4 sm:$0xff]  }
  0x49   : > { %1111 = vmatprep.mubr.bf16.mxu1 %v397_v34  ;;  %v2618_v34 = vld [vmem:[%s3628_s1 + $0x2f0] ss:$8 sps:$4 sm:$0xff]  }
  0x4a   : > { %1221 = vmatpush1.bf16.msra.mxu0 %v2566_v35  ;;  %v2651_v35 = vld [vmem:[%s3628_s1 + $0xa4] ss:$8 sps:$4 sm:$0xff]  }
  0x4b   : > { %1222 = vmatprep.subr.bf16.mxu0 %v2567_v37  ;;  %v342_v37 = vld [vmem:[%s2917_s30 + $0x1d0] sm:$0xff]  ;;  %1099 = vmatprep.subr.bf16.mxu1 %v2651_v35  ;;  %v2669_v35 = vld [vmem:[%s3630_s3] ss:$8 sps:$4 sm:$0xff]  }
  0x4c   : > { %v426_v44 = vpack.c.bf16 %v349_v38, %v342_v37  ;;  %v288_v37 = vld [vmem:[%s2917_s30 + $0x20] sm:$0xff]  ;;  %v295_v38 = vld [vmem:[%s2917_s30 + $0x58] sm:$0xff] }
  0x4e   : > { %1223 = vmatpush1.bf16.msra.mxu0 %v2569_v39  ;;  %v2596_v39 = vld [vmem:[%s3628_s1 + $0x284] ss:$8 sps:$4 sm:$0xff]  }
  0x4f   : > { %1305 = vmatprep.subr.bf16.mxu0 %v2572_v42  ;;  %v2653_v42 = vld [vmem:[%s3628_s1 + $0xa0] ss:$8 sps:$4 sm:$0xff]  }
  0x50   : > { %1100 = vmatpush1.bf16.msra.mxu1 %v2653_v42  ;;  %v303_v42 = vld [vmem:[%s2917_s30 + $0x98] sm:$0xff] }
  0x51   : > { %1225 = vmatmul.mubr.bf16.vlgmr.msra.gmra.mrb[0].mxu0 %v398_v49  ;;  %v2656_v49 = vld [vmem:[%s3628_s1 + $0xb0] ss:$8 sps:$4 sm:$0xff]   ;;  %1101 = vmatprep.subr.bf16.mxu1 %v2654_v43 }
  0x52   : > { %1306 = vmatpush1.bf16.msra.mxu0 %v2570_v50  ;;  %1234 = vmatprep.mubr.bf16.mxu0 %v406_v52  ;;  %v2597_v50 = vld [vmem:[%s3628_s1 + $0x290] ss:$8 sps:$4 sm:$0xff]  }
  0x53   : > { %1307 = vmatprep.subr.bf16.mxu0 %v2575_v51  ;;  %v356_v51 = vld [vmem:[%s2917_s30 + $0x240] sm:$0xff]  ;;  %v363_v52 = vld [vmem:[%s2917_s30 + $0x278] sm:$0xff]  ;;  %v310_v43 = vld [vmem:[%s2917_s30 + $0xd0] sm:$0xff] }
  0x54   : > { %1102 = vmatpush1.bf16.msra.mxu1 %v2656_v49  ;;  %v433_v60 = vpack.c.bf16 %v363_v52, %v356_v51  ;;  %v2624_v49 = vld [vmem:[%s3628_s1 + $0x300] ss:$8 sps:$4 sm:$0xff]   ;;  %v319_v52 = vld [vmem:[%s2917_s30 + $0x118] sm:$0xff] }
  0x55   : > { %1103 = vmatprep.subr.bf16.mxu1 %v2657_v53  ;;  %v312_v51 = vld [vmem:[%s2917_s30 + $0xe0] sm:$0xff]  ;;  %v327_v53 = vld [vmem:[%s2917_s30 + $0x158] sm:$0xff] }
  0x56   : > { %1308 = vmatpush1.bf16.msra.mxu0 %v2573_v54  ;;  %v2602_v54 = vld [vmem:[%s3628_s1 + $0x2a4] ss:$8 sps:$4 sm:$0xff]  }
  0x57   : > { %1309 = vmatprep.subr.bf16.mxu0 %v2578_v58  ;;  %v2660_v58 = vld [vmem:[%s3628_s1 + $0xd4] ss:$8 sps:$4 sm:$0xff]  }
  0x58   : > { %1104 = vmatpush1.bf16.msra.mxu1 %v2659_v57  ;;  %v302_v57 = vld [vmem:[%s2917_s30 + $0x90] sm:$0xff] }
  0x59   : > { %1235 = vmatmul.mubr.bf16.gmra.mrb[4].mxu0 %v405_v63  ;;  %v441_v63 = vpack.c.bf16 %v378_v56, %v371_v55  ;;  %1105 = vmatprep.subr.bf16.mxu1 %v2660_v58  ;;  %v2675_v55 = vld [vmem:[%s3630_s3 + $0x20] ss:$8 sps:$4 sm:$0xff]   ;;  %v2680_v56 = vld [vmem:[%s3630_s3 + $0x34] ss:$8 sps:$4 sm:$0xff]  }
  0x5a   : > { %1310 = vmatpush1.bf16.msra.mxu0 %v2576_v0  ;;  %1244 = vmatprep.mubr.bf16.mxu0 %v413_v2  ;;  %v2603_v0 = vld [vmem:[%s3628_s1 + $0x2b0] ss:$8 sps:$4 sm:$0xff]   ;;  %v377_v2 = vld [vmem:[%s2917_s30 + $0x2e8] sm:$0xff] }
  0x5b   : > { %1311 = vmatprep.subr.bf16.mxu0 %v2581_v1  ;;  %v370_v1 = vld [vmem:[%s2917_s30 + $0x2b0] sm:$0xff]  ;;  %v309_v58 = vld [vmem:[%s2917_s30 + $0xc8] sm:$0xff] }
  0x5c   : > { %1106 = vmatpush1.bf16.msra.mxu1 %v2662_v62  ;;  %v440_v9 = vpack.c.bf16 %v377_v2, %v370_v1  ;;  %v2683_v1 = vld [vmem:[%s3630_s3 + $0x44] ss:$8 sps:$4 sm:$0xff]  }
  0x5d   : > { %1107 = vmatprep.subr.bf16.mxu1 %v2663_v3  ;;  %v326_v3 = vld [vmem:[%s2917_s30 + $0x150] sm:$0xff] }
  0x5e   : > { %1312 = vmatpush1.bf16.msra.mxu0 %v2579_v4  ;;  %v2608_v4 = vld [vmem:[%s3628_s1 + $0x2c4] ss:$8 sps:$4 sm:$0xff]  }
  0x5f   : > { %1313 = vmatprep.subr.bf16.mxu0 %v2584_v8  ;;  %v2666_v8 = vld [vmem:[%s3628_s1 + $0xf4] ss:$8 sps:$4 sm:$0xff]  }
  0x60   : > { %1108 = vmatpush1.bf16.msra.mxu1 %v2665_v7  ;;  %v2681_v7 = vld [vmem:[%s3630_s3 + $0x40] ss:$8 sps:$4 sm:$0xff]  }
  0x61   : > { %1245 = vmatmul.mubr.bf16.gmra.mrb[8].mxu0 %v412_v13  ;;  %v2668_v13 = vld [vmem:[%s3628_s1 + $0xf0] ss:$8 sps:$4 sm:$0xff]   ;;  %1109 = vmatprep.subr.bf16.mxu1 %v2666_v8  ;;  %v2686_v8 = vld [vmem:[%s3630_s3 + $0x54] ss:$8 sps:$4 sm:$0xff]  }
  0x62   : > { %1314 = vmatpush1.bf16.msra.mxu0 %v2582_v14  ;;  %1254 = vmatprep.mubr.bf16.mxu0 %v420_v16  ;;  %v284_v14 = vld [vmem:[%s2917_s30] sm:$0xff]  ;;  %v299_v16 = vld [vmem:[%s2917_s30 + $0x78] sm:$0xff] }
  0x63   : > { %1315 = vmatprep.subr.bf16.mxu0 %v2587_v15  ;;  %v291_v15 = vld [vmem:[%s2917_s30 + $0x38] sm:$0xff]  ;;  %v404_v25 = vpack.c.bf16 %v306_v17, %v299_v16  ;;  %v2689_v17 = vld [vmem:[%s3630_s3 + $0x64] ss:$8 sps:$4 sm:$0xff]  }
  0x64   : > { %v396_v21 = vpack.c.bf16 %v291_v15, %v284_v14  ;;  %1110 = vmatpush1.bf16.msra.mxu1 %v2668_v13  ;;  %v338_v13 = vld [vmem:[%s2917_s30 + $0x1b0] sm:$0xff]  ;;  %v425_v14 = vpack.c.bf16 %v348_v6, %v341_v5  ;;  %v372_v5 = vld [vmem:[%s2917_s30 + $0x2c0] sm:$0xff]  ;;  %v379_v6 = vld [vmem:[%s2917_s30 + $0x2f8] sm:$0xff] }
  0x65   : > { %v2684_v15 = vld [vmem:[%s3630_s3 + $0x50] ss:$8 sps:$4 sm:$0xff]  }
  0x66   : > { %1316 = vmatpush1.bf16.msra.mxu0 %v2585_v18  ;;  %v2609_v18 = vld [vmem:[%s3628_s1 + $0x2d0] ss:$8 sps:$4 sm:$0xff]  }
  0x67   : > { %1317 = vmatprep.subr.bf16.mxu0 %v2590_v22  ;;  %v2614_v22 = vld [vmem:[%s3628_s1 + $0x2e4] ss:$8 sps:$4 sm:$0xff]   ;;  %1112 = vmatmul.mubr.bf16.vlgmr.msra.gmra.mrb[0].mxu1 %v396_v21  ;;  %v355_v21 = vld [vmem:[%s2917_s30 + $0x238] sm:$0xff] }
  0x68   : > { %1121 = vmatprep.mubr.bf16.mxu1 %v404_v25  ;;  %v330_v25 = vld [vmem:[%s2917_s30 + $0x170] sm:$0xff] }
  0x69   : > { %1255 = vmatmul.mubr.bf16.gmra.mrb[12].mxu0 %v419_v27  ;;  %v2612_v27 = vld [vmem:[%s3628_s1 + $0x2e0] ss:$8 sps:$4 sm:$0xff]  }
  0x6a   : > { %1318 = vmatpush1.bf16.msra.mxu0 %v2588_v29  ;;  %1264 = vmatprep.mubr.bf16.mxu0 %v427_v30  ;;  %v2620_v29 = vld [vmem:[%s3628_s1 + $0x2f4] ss:$8 sps:$4 sm:$0xff]  }
  0x6b   : > { %1319 = vmatprep.subr.bf16.mxu0 %v2593_v32  ;;  %v298_v30 = vld [vmem:[%s2917_s30 + $0x70] sm:$0xff]  ;;  %v313_v32 = vld [vmem:[%s2917_s30 + $0xe8] sm:$0xff] }
  0x6e   : > { %1320 = vmatpush1.bf16.msra.mxu0 %v2591_v36  ;;  %v2671_v36 = vld [vmem:[%s3630_s3 + $0x4] ss:$8 sps:$4 sm:$0xff]  }
  0x6f   : > { %1321 = vmatprep.subr.bf16.mxu0 %v2596_v39  ;;  %v403_v39 = vpack.c.bf16 %v305_v31, %v298_v30  ;;  %1846 = vmatprep.subr.bf16.mxu1 %v2671_v36  ;;  %v2690_v31 = vld [vmem:[%s3630_s3 + $0x70] ss:$8 sps:$4 sm:$0xff]   ;;  %v361_v36 = vld [vmem:[%s2917_s30 + $0x268] sm:$0xff] }
  0x70   : > { %1847 = vmatpush1.bf16.msra.mxu1 %v2669_v35  ;;  %v354_v35 = vld [vmem:[%s2917_s30 + $0x230] sm:$0xff] }
  0x71   : > { %1265 = vmatmul.mubr.bf16.gmra.mrb[16].mxu0 %v426_v44  ;;  %v411_v44 = vpack.c.bf16 %v320_v33, %v313_v32  ;;  %1848 = vmatprep.subr.bf16.mxu1 %v2674_v40  ;;  %v2695_v33 = vld [vmem:[%s3630_s3 + $0x84] ss:$8 sps:$4 sm:$0xff]   ;;  %v2698_v40 = vld [vmem:[%s3630_s3 + $0x94] ss:$8 sps:$4 sm:$0xff]  }
  0x72   : > { %1322 = vmatpush1.bf16.msra.mxu0 %v2594_v45  ;;  %1274 = vmatprep.mubr.bf16.mxu0 %v434_v46  ;;  %v2672_v45 = vld [vmem:[%s3630_s3 + $0x10] ss:$8 sps:$4 sm:$0xff]   ;;  %v400_v46 = vpack.c.bf16 %v295_v38, %v288_v37  ;;  %v369_v37 = vld [vmem:[%s2917_s30 + $0x2a8] sm:$0xff]  ;;  %v376_v38 = vld [vmem:[%s2917_s30 + $0x2e0] sm:$0xff] }
  0x73   : > { %1323 = vmatprep.subr.bf16.mxu0 %v2599_v47  ;;  %v2677_v47 = vld [vmem:[%s3630_s3 + $0x24] ss:$8 sps:$4 sm:$0xff]   ;;  %1122 = vmatmul.mubr.bf16.gmra.mrb[4].mxu1 %v403_v39  ;;  %v2693_v39 = vld [vmem:[%s3630_s3 + $0x80] ss:$8 sps:$4 sm:$0xff]  }
  0x74   : > { %1131 = vmatprep.mubr.bf16.mxu1 %v411_v44  ;;  %1849 = vmatpush1.bf16.msra.mxu1 %v2672_v45  ;;  %v359_v44 = vld [vmem:[%s2917_s30 + $0x258] sm:$0xff]  ;;  %v366_v45 = vld [vmem:[%s2917_s30 + $0x290] sm:$0xff] }
  0x75   : > { %1850 = vmatprep.subr.bf16.mxu1 %v2677_v47  ;;  %v2696_v47 = vld [vmem:[%s3630_s3 + $0x90] ss:$8 sps:$4 sm:$0xff]  }
  0x76   : > { %1324 = vmatpush1.bf16.msra.mxu0 %v2597_v50  ;;  %v408_v50 = vpack.c.bf16 %v310_v43, %v303_v42  ;;  %v351_v42 = vld [vmem:[%s2917_s30 + $0x218] sm:$0xff]  ;;  %v431_v43 = vpack.c.bf16 %v361_v36, %v354_v35  ;;  %v374_v35 = vld [vmem:[%s2917_s30 + $0x2d0] sm:$0xff]  ;;  %v381_v36 = vld [vmem:[%s2917_s30 + $0x308] sm:$0xff] }
  0x77   : > { %1325 = vmatprep.subr.bf16.mxu0 %v2602_v54  ;;  %v334_v54 = vld [vmem:[%s2917_s30 + $0x190] sm:$0xff] }
  0x78   : > { %v418_v62 = vpack.c.bf16 %v334_v54, %v327_v53  ;;  %1851 = vmatpush1.bf16.msra.mxu1 %v2675_v55  ;;  %v375_v53 = vld [vmem:[%s2917_s30 + $0x2d8] sm:$0xff]  ;;  %v390_v55 = vld [vmem:[%s2917_s30 + $0x350] sm:$0xff] }
  0x79   : > { %1275 = vmatmul.mubr.bf16.gmra.mrb[20].mxu0 %v433_v60  ;;  %v317_v60 = vld [vmem:[%s2917_s30 + $0x108] sm:$0xff]  ;;  %1852 = vmatprep.subr.bf16.mxu1 %v2680_v56  ;;  %v383_v54 = vld [vmem:[%s2917_s30 + $0x318] sm:$0xff] }
  0x7a   : > { %1326 = vmatpush1.bf16.msra.mxu0 %v2600_v59  ;;  %1284 = vmatprep.mubr.bf16.mxu0 %v441_v63  ;;  %v410_v59 = vpack.c.bf16 %v319_v52, %v312_v51  ;;  %v2678_v63 = vld [vmem:[%s3630_s3 + $0x30] ss:$8 sps:$4 sm:$0xff]   ;;  %v436_v51 = vpack.c.bf16 %v366_v45, %v359_v44  ;;  %v368_v52 = vld [vmem:[%s2917_s30 + $0x2a0] sm:$0xff]  ;;  %v2716_v44 = vld [vmem:[%s3630_s3 + $0xf4] ss:$8 sps:$4 sm:$0xff]  }
  0x7b   : > { %1327 = vmatprep.subr.bf16.mxu0 %v2605_v61  ;;  %v324_v61 = vld [vmem:[%s2917_s30 + $0x140] sm:$0xff]  ;;  %v2714_v45 = vld [vmem:[%s3630_s3 + $0xf0] ss:$8 sps:$4 sm:$0xff]  }
  0x7c   : > { %v415_v2 = vpack.c.bf16 %v324_v61, %v317_v60  ;;  %1132 = vmatmul.mubr.bf16.gmra.mrb[8].mxu1 %v410_v59  ;;  %v2699_v56 = vld [vmem:[%s3630_s3 + $0xa0] ss:$8 sps:$4 sm:$0xff]   ;;  %v438_v60 = vpack.c.bf16 %v375_v53, %v368_v52 }
  0x7d   : > { %1141 = vmatprep.mubr.bf16.mxu1 %v418_v62  ;;  %1853 = vmatpush1.bf16.msra.mxu1 %v2678_v63  ;;  %v365_v59 = vld [vmem:[%s2917_s30 + $0x288] sm:$0xff]  ;;  %v380_v62 = vld [vmem:[%s2917_s30 + $0x300] sm:$0xff]  ;;  %v446_v63 = vpack.c.bf16 %v390_v55, %v383_v54 }
  0x7e   : > { %1328 = vmatpush1.bf16.msra.mxu0 %v2603_v0  ;;  %v407_v0 = vpack.c.bf16 %v309_v58, %v302_v57  ;;  %1854 = vmatprep.subr.bf16.mxu1 %v2683_v1  ;;  %v2704_v57 = vld [vmem:[%s3630_s3 + $0xb4] ss:$8 sps:$4 sm:$0xff]   ;;  %v373_v61 = vld [vmem:[%s2917_s30 + $0x2c8] sm:$0xff] }
  0x7f   : > { %1329 = vmatprep.subr.bf16.mxu0 %v2608_v4  ;;  %v333_v4 = vld [vmem:[%s2917_s30 + $0x188] sm:$0xff]  ;;  %v358_v58 = vld [vmem:[%s2917_s30 + $0x250] sm:$0xff] }
  0x80   : > { %v435_v1 = vpack.c.bf16 %v365_v59, %v358_v58 }
  0x81   : > { %1285 = vmatmul.mubr.bf16.gmra.mrb[24].mxu0 %v440_v9  ;;  %v316_v9 = vld [vmem:[%s2917_s30 + $0x100] sm:$0xff]  ;;  %1855 = vmatpush1.bf16.msra.mxu1 %v2681_v7 }
  0x82   : > { %1330 = vmatpush1.bf16.msra.mxu0 %v2606_v10  ;;  %1294 = vmatprep.mubr.bf16.mxu0 %v448_v12  ;;  %v323_v10 = vld [vmem:[%s2917_s30 + $0x138] sm:$0xff] }
  0x83   : > { %1331 = vmatprep.subr.bf16.mxu0 %v2611_v11  ;;  %v417_v11 = vpack.c.bf16 %v333_v4, %v326_v3  ;;  %v331_v12 = vld [vmem:[%s2917_s30 + $0x178] sm:$0xff]  ;;  %v414_v16 = vpack.c.bf16 %v323_v10, %v316_v9  ;;  %1856 = vmatprep.subr.bf16.mxu1 %v2686_v8  ;;  %v382_v3 = vld [vmem:[%s2917_s30 + $0x310] sm:$0xff]  ;;  %v389_v4 = vld [vmem:[%s2917_s30 + $0x348] sm:$0xff]  ;;  %v442_v10 = vpack.c.bf16 %v379_v6, %v372_v5 }
  0x84   : > { %v445_v7 = vpack.c.bf16 %v389_v4, %v382_v3  ;;  %v387_v8 = vld [vmem:[%s2917_s30 + $0x338] sm:$0xff]  ;;  %v394_v9 = vld [vmem:[%s2917_s30 + $0x370] sm:$0xff] }
  0x85   : > { %1142 = vmatmul.mubr.bf16.gmra.mrb[12].mxu1 %v417_v11  ;;  %v450_v11 = vpack.c.bf16 %v394_v9, %v387_v8 }
  0x86   : > { %1332 = vmatpush1.bf16.msra.mxu0 %v2609_v18  ;;  %v422_v18 = vpack.c.bf16 %v338_v13, %v331_v12  ;;  %1151 = vmatprep.mubr.bf16.mxu1 %v425_v14  ;;  %v386_v12 = vld [vmem:[%s2917_s30 + $0x330] sm:$0xff]  ;;  %v393_v13 = vld [vmem:[%s2917_s30 + $0x368] sm:$0xff] }
  0x87   : > { %1333 = vmatprep.subr.bf16.mxu0 %v2614_v22  ;;  %v362_v22 = vld [vmem:[%s2917_s30 + $0x270] sm:$0xff]  ;;  %1857 = vmatpush1.bf16.msra.mxu1 %v2684_v15  ;;  %v449_v14 = vpack.c.bf16 %v393_v13, %v386_v12 }
  0x88   : > { %1858 = vmatprep.subr.bf16.mxu1 %v2689_v17  ;;  %v432_v30 = vpack.c.bf16 %v362_v22, %v355_v21  ;;  %v290_v15 = vld [vmem:[%s2917_s30 + $0x30] sm:$0xff]  ;;  %v325_v22 = vld [vmem:[%s2917_s30 + $0x148] sm:$0xff] }
  0x89   : > { %1295 = vmatmul.mubr.bf16.gmra.mrb[28].mxu0 %v447_v26  ;;  %v337_v26 = vld [vmem:[%s2917_s30 + $0x1a8] sm:$0xff]  ;;  %v318_v21 = vld [vmem:[%s2917_s30 + $0x110] sm:$0xff] }
  0x8a   : > { %1334 = vmatpush1.bf16.msra.mxu0 %v2612_v27  ;;  %1337 = vmatprep.mubr.bf16.mxu0 %v401_v28  ;;  %v424_v27 = vpack.c.bf16 %v347_v20, %v340_v19  ;;  %v345_v28 = vld [vmem:[%s2917_s30 + $0x1e8] sm:$0xff]  ;;  %v421_v32 = vpack.c.bf16 %v337_v26, %v330_v25  ;;  %v311_v19 = vld [vmem:[%s2917_s30 + $0xd8] sm:$0xff]  ;;  %v416_v25 = vpack.c.bf16 %v325_v22, %v318_v21  ;;  %v332_v26 = vld [vmem:[%s2917_s30 + $0x180] sm:$0xff] }
  0x8b   : > { %1335 = vmatprep.subr.bf16.mxu0 %v2620_v29  ;;  %v352_v29 = vld [vmem:[%s2917_s30 + $0x220] sm:$0xff]  ;;  %1859 = vmatpush1.bf16.msra.mxu1 %v2687_v23 }
  0x8c   : > { %1860 = vmatprep.subr.bf16.mxu1 %v2692_v24  ;;  %v2705_v23 = vld [vmem:[%s3630_s3 + $0xc0] ss:$8 sps:$4 sm:$0xff]   ;;  %v2707_v24 = vld [vmem:[%s3630_s3 + $0xc4] ss:$8 sps:$4 sm:$0xff]  }
  0x8d   : > { %1152 = vmatmul.mubr.bf16.gmra.mrb[16].mxu1 %v424_v27  ;;  %v339_v27 = vld [vmem:[%s2917_s30 + $0x1b8] sm:$0xff] }
  0x8e   : > { %1336 = vmatpush1.bf16.msra.mxu0 %v2618_v34  ;;  %v429_v34 = vpack.c.bf16 %v352_v29, %v345_v28  ;;  %1161 = vmatprep.mubr.bf16.mxu1 %v432_v30  ;;  %v423_v28 = vpack.c.bf16 %v339_v27, %v332_v26  ;;  %v346_v29 = vld [vmem:[%s2917_s30 + $0x1f0] sm:$0xff]  ;;  %v353_v30 = vld [vmem:[%s2917_s30 + $0x228] sm:$0xff] }
  0x8f   : > { %1418 = vmatprep.subr.bf16.mxu0 %v2626_v41  ;;  %1861 = vmatpush1.bf16.msra.mxu1 %v2690_v31  ;;  %v344_v41 = vld [vmem:[%s2917_s30 + $0x1e0] sm:$0xff]  ;;  %v430_v31 = vpack.c.bf16 %v353_v30, %v346_v29 }
  0x90   : > { %1862 = vmatprep.subr.bf16.mxu1 %v2695_v33  ;;  %v367_v33 = vld [vmem:[%s2917_s30 + $0x298] sm:$0xff] }
  0x91   : > { %1338 = vmatmul.mubr.bf16.vlgmr.msra.gmra.mrb[0].mxu0 %v400_v46  ;;  %v439_v46 = vpack.c.bf16 %v376_v38, %v369_v37  ;;  %v444_v37 = vpack.c.bf16 %v381_v36, %v374_v35  ;;  %v388_v38 = vld [vmem:[%s2917_s30 + $0x340] sm:$0xff] }
  0x92   : > { %1419 = vmatpush1.bf16.msra.mxu0 %v2624_v49  ;;  %1347 = vmatprep.mubr.bf16.mxu0 %v408_v50  ;;  %v428_v49 = vpack.c.bf16 %v351_v42, %v344_v41  ;;  %v2701_v50 = vld [vmem:[%s3630_s3 + $0xa4] ss:$8 sps:$4 sm:$0xff]   ;;  %v2710_v41 = vld [vmem:[%s3630_s3 + $0xd4] ss:$8 sps:$4 sm:$0xff]   ;;  %v2708_v42 = vld [vmem:[%s3630_s3 + $0xd0] ss:$8 sps:$4 sm:$0xff]  }
  0x93   : > { %1863 = vmatpush1.bf16.msra.mxu1 %v2693_v39  ;;  %v395_v39 = vld [vmem:[%s2917_s30 + $0x378] sm:$0xff] }
  0x94   : > { %1864 = vmatprep.subr.bf16.mxu1 %v2698_v40  ;;  %v451_v40 = vpack.c.bf16 %v395_v39, %v388_v38 }
  0x95   : > { %1162 = vmatmul.mubr.bf16.gmra.mrb[20].mxu1 %v431_v43  ;;  %v2713_v43 = vld [vmem:[%s3630_s3 + $0xe4] ss:$8 sps:$4 sm:$0xff]  }
  0x96   : > { %1171 = vmatprep.mubr.bf16.mxu1 %v439_v46 }
  0x97   : > { %1865 = vmatpush1.bf16.msra.mxu1 %v2696_v47 }
  0x98   : > { %1866 = vmatprep.subr.bf16.mxu1 %v2701_v50 }
  0x99   : > { %1348 = vmatmul.mubr.bf16.gmra.mrb[4].mxu0 %v407_v0  ;;  %v2702_v0 = vld [vmem:[%s3630_s3 + $0xb0] ss:$8 sps:$4 sm:$0xff]  }
  0x9a   : > { %1357 = vmatprep.mubr.bf16.mxu0 %v415_v2  ;;  %v443_v2 = vpack.c.bf16 %v380_v62, %v373_v61 }
  0x9b   : > { %1867 = vmatpush1.bf16.msra.mxu1 %v2699_v56 }
  0x9c   : > { %1868 = vmatprep.subr.bf16.mxu1 %v2704_v57 }
  0x9d   : > { %1172 = vmatmul.mubr.bf16.gmra.mrb[24].mxu1 %v438_v60 }
  0x9e   : > { %1181 = vmatprep.mubr.bf16.mxu1 %v446_v63 }
  0x9f   : > { %1869 = vmatpush1.bf16.msra.mxu1 %v2702_v0 }
  0xa0   : > { %1870 = vmatprep.subr.bf16.mxu1 %v2707_v24 }
  0xa1   : > { %1358 = vmatmul.mubr.bf16.gmra.mrb[8].mxu0 %v414_v16  ;;  %v297_v16 = vld [vmem:[%s2917_s30 + $0x68] sm:$0xff] }
  0xa2   : > { %1367 = vmatprep.mubr.bf16.mxu0 %v422_v18  ;;  %v402_v17 = vpack.c.bf16 %v297_v16, %v290_v15  ;;  %v304_v18 = vld [vmem:[%s2917_s30 + $0xa0] sm:$0xff] }
  0xa3   : > { %v409_v20 = vpack.c.bf16 %v311_v19, %v304_v18  ;;  %1871 = vmatpush1.bf16.msra.mxu1 %v2705_v23  ;;  %v452_v18 = vld [vmem:[%s3629_s2] sm:$0x3] }
  0xa4   : > { %1872 = vmatprep.subr.bf16.mxu1 %v2710_v41 }
  0xa5   : > { %1182 = vmatmul.mubr.bf16.gmra.mrb[28].mxu1 %v445_v7 }
  0xa7   : > { %1873 = vmatpush1.bf16.msra.mxu1 %v2708_v42 }
  0xa8   : > { %1874 = vmatprep.subr.bf16.mxu1 %v2713_v43 }
  0xa9   : > { %1368 = vmatmul.mubr.bf16.gmra.mrb[12].mxu0 %v421_v32  ;;  %v360_v32 = vld [vmem:[%s2917_s30 + $0x260] sm:$0xff]  ;;  %s3585_s30 = scalar_lea.hbm %s3634_s7, %s2889_s22 }
  0xaa   : > { %1377 = vmatprep.mubr.bf16.mxu0 %v429_v34  ;;  %v437_v34 = vpack.c.bf16 %v367_v33, %v360_v32 }
  0xb1   : > { %1378 = vmatmul.mubr.bf16.gmra.mrb[16].mxu0 %v428_v49 }
  0xb2   : > { %1387 = vmatprep.mubr.bf16.mxu0 %v436_v51 }
  0xb9   : > { %1388 = vmatmul.mubr.bf16.gmra.mrb[20].mxu0 %v435_v1 }
  0xba   : > { %1397 = vmatprep.mubr.bf16.mxu0 %v443_v2 }
  0xc1   : > { %1398 = vmatmul.mubr.bf16.gmra.mrb[24].mxu0 %v442_v10 }
  0xc2   : > { %1407 = vmatprep.mubr.bf16.mxu0 %v450_v11  ;;  %v554_v11 = vlaneseq }
  0xc4   : > { %v3455_v16 = vshrl.u32 %v554_v11, 7 }
  0xc6   : > { %v560_v19 = vsub.s32 1, %v3455_v16 }
  0xc8   : > { %v3469_v21 = vrot.slane %v452_v18, %v560_v19 }
  0xc9   : > { %1408 = vmatmul.mubr.bf16.gmra.mrb[28].mxu0 %v449_v14 }
  0xca   : > { %1450 = vmatprep.mubr.bf16.mxu0 %v2787_v48 }
  0xd1   : > { %2307 = vmatmul.mubr.msk.bf16.vlgmr.msra.gmra.mrb[0].mxu0 %vm1054_vm0, %v402_v17  ;;  %v3458_v17 = vsub.s32 0, %v3455_v16 }
  0xd2   : > { %1460 = vmatprep.mubr.bf16.mxu0 %v2787_v48 }
  0xd9   : > { %2308 = vmatmul.mubr.msk.bf16.gmra.mrb[4].mxu0 %vm1054_vm0, %v409_v20  ;;  %v3465_v20 = vrot.slane %v452_v18, %v3458_v17 }
  0xda   : > { %1470 = vmatprep.mubr.bf16.mxu0 %v2787_v48 }
  0xe1   : > { %2309 = vmatmul.mubr.msk.bf16.gmra.mrb[8].mxu0 %vm1054_vm0, %v416_v25 }
  0xe2   : > { %1480 = vmatprep.mubr.bf16.mxu0 %v2787_v48 }
  0xe9   : > { %2310 = vmatmul.mubr.msk.bf16.gmra.mrb[12].mxu0 %vm1054_vm0, %v423_v28 }
  0xea   : > { %1490 = vmatprep.mubr.bf16.mxu0 %v2787_v48 }
  0xf1   : > { %2311 = vmatmul.mubr.msk.bf16.gmra.mrb[16].mxu0 %vm1054_vm0, %v430_v31 }
  0xf2   : > { %1500 = vmatprep.mubr.bf16.mxu0 %v2787_v48 }
  0xf9   : > { %2312 = vmatmul.mubr.msk.bf16.gmra.mrb[20].mxu0 %vm1054_vm0, %v437_v34 }
  0xfa   : > { %1510 = vmatprep.mubr.bf16.mxu0 %v2787_v48 }
 0x101   : > { %2313 = vmatmul.mubr.msk.bf16.gmra.mrb[24].mxu0 %vm1054_vm0, %v444_v37 }
 0x102   : > { %1520 = vmatprep.mubr.bf16.mxu0 %v2787_v48  ;;  %v2711_v48 = vld [vmem:[%s3630_s3 + $0xe0] ss:$8 sps:$4 sm:$0xff]  }
 0x103   : > { %1875 = vmatpush1.bf16.msra.mxu1 %v2711_v48 }
 0x104   : > { %1876 = vmatprep.subr.bf16.mxu1 %v2716_v44 }
 0x107   : > { %1877 = vmatpush1.bf16.msra.mxu1 %v2714_v45 }
 0x109   : > { %2314 = vmatmul.mubr.msk.bf16.gmra.mrb[28].mxu0 %vm1054_vm0, %v451_v40 }
 0x13a   : > { %v1113_v46 = vpop.f32.mrb[0].mxu1 }
 0x13b   : > { %v1115_v47 = vpop.f32.mrb[1].mxu1  ;;  %v1114_v22 = vadd.f32 %v1113_v46, %v3465_v20 }
 0x13c   : > { %v1117_v49 = vpop.f32.mrb[2].mxu1  ;;  %v1116_v23 = vadd.f32 %v1115_v47, %v3469_v21 }
 0x13d   : > { %v1119_v50 = vpop.f32.mrb[3].mxu1  ;;  %v1118_v25 = vadd.f32 %v1117_v49, %v3465_v20 }
 0x13e   : > { %v1120_v28 = vadd.f32 %v1119_v50, %v3469_v21 }
 0x146   : > { %v1123_v51 = vpop.f32.mrb[4].mxu1 }
 0x147   : > { %v1125_v52 = vpop.f32.mrb[5].mxu1  ;;  %v1124_v37 = vadd.f32 %v1123_v51, %v3465_v20 }
 0x148   : > { %v1127_v53 = vpop.f32.mrb[6].mxu1  ;;  %v1126_v39 = vadd.f32 %v1125_v52, %v3469_v21 }
 0x149   : > { %v3405_v54 = vpop.f32.mrb[7].mxu1  ;;  %v1128_v45 = vadd.f32 %v1127_v53, %v3465_v20 }
 0x14a   : > { %v1130_v50 = vadd.f32 %v3405_v54, %v3469_v21 }
 0x14f   : > { %v3407_v55 = vpop.f32.mrb[8].mxu1 }
 0x150   : > { %v3409_v56 = vpop.f32.mrb[9].mxu1  ;;  %v1134_v53 = vadd.f32 %v3407_v55, %v3465_v20 }
 0x151   : > { %v3411_v57 = vpop.f32.mrb[10].mxu1  ;;  %v1136_v54 = vadd.f32 %v3409_v56, %v3469_v21 }
 0x152   : > { %v3413_v58 = vpop.f32.mrb[11].mxu1 }
 0x153   : > { %v1140_v55 = vadd.f32 %v3413_v58, %v3469_v21 }
 0x158   : > { %v3415_v59 = vpop.f32.mrb[12].mxu1 }
 0x159   : > { %v3417_v60 = vpop.f32.mrb[13].mxu1 }
 0x15a   : > { %v3419_v61 = vpop.f32.mrb[14].mxu1  ;;  %v1146_v58 = vadd.f32 %v3417_v60, %v3469_v21 }
 0x15b   : > { %v3421_v62 = vpop.f32.mrb[15].mxu1 }
 0x160   : > { %v3423_v63 = vpop.f32.mrb[16].mxu1 }
 0x161   : > { %v3425_v0 = vpop.f32.mrb[17].mxu1 }
 0x162   : > { %v3427_v1 = vpop.f32.mrb[18].mxu1 }
 0x163   : > { %v3429_v2 = vpop.f32.mrb[19].mxu1 }
 0x168   : > { %v3431_v3 = vpop.f32.mrb[20].mxu1 }
 0x169   : > { %v3433_v4 = vpop.f32.mrb[21].mxu1 }
 0x16a   : > { %v3435_v5 = vpop.f32.mrb[22].mxu1 }
 0x16b   : > { %v3437_v6 = vpop.f32.mrb[23].mxu1 }
 0x170   : > { %v3439_v7 = vpop.f32.mrb[24].mxu1 }
 0x171   : > { %v3441_v8 = vpop.f32.mrb[25].mxu1 }
 0x172   : > { %v3443_v9 = vpop.f32.mrb[26].mxu1 }
 0x173   : > { %v3445_v10 = vpop.f32.mrb[27].mxu1 }
 0x178   : > { %v3447_v12 = vpop.f32.mrb[28].mxu1 }
 0x179   : > { %v3449_v13 = vpop.f32.mrb[29].mxu1 }
 0x17a   : > { %v3451_v14 = vpop.f32.mrb[30].mxu1 }
 0x17b   : > { %v3453_v15 = vpop.f32.mrb[31].mxu1 }
 0x1a4   : > { %v1452_v24 = vpop.f32.mrb[0].mxu0 }
 0x1a5   : > { %v2353_v26 = vadd.f32 %v1452_v24, %v1114_v22  ;;  %v1454_v27 = vpop.f32.mrb[1].mxu0 }
 0x1a6   : > { %v2355_v29 = vadd.f32 %v1454_v27, %v1116_v23  ;;  %v1456_v30 = vpop.f32.mrb[2].mxu0 }
 0x1a7   : > { %v1563_v31 = vmul.f32 0.01, %v2353_v26  ;;  %v2357_v32 = vadd.f32 %v1456_v30, %v1118_v25  ;;  %v1458_v33 = vpop.f32.mrb[3].mxu0  ;;  %vm1531_vm1 = vcmp.ge.f32.partialorder %v2353_v26, 0.0 }
 0x1a8   : > { %v1564_v34 = vmul.f32 0.01, %v2355_v29  ;;  %v2359_v35 = vadd.f32 %v1458_v33, %v1120_v28  ;;  %vm1532_vm2 = vcmp.ge.f32.partialorder %v2355_v29, 0.0  ;;  %v1138_v33 = vadd.f32 %v3411_v57, %v3465_v20 }
 0x1a9   : > { %vm1533_vm3 = vcmp.ge.f32.partialorder %v2357_v32, 0.0  ;;  %v1565_v36 = vmul.f32 0.01, %v2357_v32  ;;  %v1595_v40 = vsel %vm1531_vm1, %v2353_v26, %v1563_v31  ;;  %v1144_v57 = vadd.f32 %v3415_v59, %v3465_v20 }
 0x1aa   : > { %vm1534_vm4 = vcmp.ge.f32.partialorder %v2359_v35, 0.0  ;;  %v1566_v38 = vmul.f32 0.01, %v2359_v35  ;;  %v1596_v48 = vsel %vm1532_vm2, %v2355_v29, %v1564_v34  ;;  %v1150_v59 = vadd.f32 %v3421_v62, %v3469_v21 }
 0x1ab   : > { %v1597_v41 = vsel %vm1533_vm3, %v2357_v32, %v1565_v36  ;;  %v1156_v62 = vadd.f32 %v3425_v0, %v3469_v21 }
 0x1ac   : > { %v1627_v42 = vpack.c.bf16 %v1597_v41, %v1595_v40  ;;  %v1462_v43 = vpop.f32.mrb[4].mxu0  ;;  %v1598_v44 = vsel %vm1534_vm4, %v2359_v35, %v1566_v38 }
 0x1ad   : > { %v2361_v46 = vadd.f32 %v1462_v43, %v1124_v37  ;;  %v1464_v47 = vpop.f32.mrb[5].mxu0  ;;  %v1628_v49 = vpack.c.bf16 %v1598_v44, %v1596_v48 }
 0x1ae   : > { %v2363_v11 = vadd.f32 %v1464_v47, %v1126_v39  ;;  %v1466_v51 = vpop.f32.mrb[6].mxu0 }
 0x1af   : > { %v1567_v18 = vmul.f32 0.01, %v2361_v46  ;;  %v2365_v22 = vadd.f32 %v1466_v51, %v1128_v45  ;;  %v1468_v23 = vpop.f32.mrb[7].mxu0  ;;  %1878 = vmatprep.mubr.bf16.mxu1 %v1628_v49  ;;  %vm1535_vm5 = vcmp.ge.f32.partialorder %v2361_v46, 0.0 }
 0x1b0   : > { %v1568_v52 = vmul.f32 0.01, %v2363_v11  ;;  %v2367_v24 = vadd.f32 %v1468_v23, %v1130_v50  ;;  %1879 = vmatmul.mubr.bf16.vlgmr.msra.gmra.mrb[32].mxu1 %v1627_v42  ;;  %vm1536_vm6 = vcmp.ge.f32.partialorder %v2363_v11, 0.0 }
 0x1b1   : > { %vm1537_vm7 = vcmp.ge.f32.partialorder %v2365_v22, 0.0  ;;  %v1569_v25 = vmul.f32 0.01, %v2365_v22  ;;  %v1599_v27 = vsel %vm1535_vm5, %v2361_v46, %v1567_v18 }
 0x1b2   : > { %vm1538_vm8 = vcmp.ge.f32.partialorder %v2367_v24, 0.0  ;;  %v1570_v26 = vmul.f32 0.01, %v2367_v24  ;;  %v1600_v30 = vsel %vm1536_vm6, %v2363_v11, %v1568_v52  ;;  %v1148_v11 = vadd.f32 %v3419_v61, %v3465_v20 }
 0x1b3   : > { %v1601_v28 = vsel %vm1537_vm7, %v2365_v22, %v1569_v25  ;;  %v1154_v61 = vadd.f32 %v3423_v63, %v3465_v20  ;;  %v1160_v63 = vadd.f32 %v3429_v2, %v3469_v21  ;;  %v1166_v2 = vadd.f32 %v3433_v4, %v3469_v21 }
 0x1b4   : > { %v1472_v29 = vpop.f32.mrb[8].mxu0  ;;  %v1602_v31 = vsel %vm1538_vm8, %v2367_v24, %v1570_v26  ;;  %v1629_v32 = vpack.c.bf16 %v1601_v28, %v1599_v27 }
 0x1b5   : > { %v2369_v34 = vadd.f32 %v1472_v29, %v1134_v53  ;;  %v1474_v35 = vpop.f32.mrb[9].mxu0  ;;  %v1630_v36 = vpack.c.bf16 %v1602_v31, %v1600_v30 }
 0x1b6   : > { %v2371_v37 = vadd.f32 %v1474_v35, %v1136_v54  ;;  %v1476_v38 = vpop.f32.mrb[10].mxu0 }
 0x1b7   : > { %v1571_v39 = vmul.f32 0.01, %v2369_v34  ;;  %v2373_v40 = vadd.f32 %v1476_v38, %v1138_v33  ;;  %v1478_v56 = vpop.f32.mrb[11].mxu0  ;;  %1888 = vmatprep.mubr.bf16.mxu1 %v1630_v36  ;;  %vm1539_vm9 = vcmp.ge.f32.partialorder %v2369_v34, 0.0 }
 0x1b8   : > { %v1572_v41 = vmul.f32 0.01, %v2371_v37  ;;  %v2375_v42 = vadd.f32 %v1478_v56, %v1140_v55  ;;  %1889 = vmatmul.mubr.bf16.gmra.mrb[36].mxu1 %v1629_v32  ;;  %vm1540_vm10 = vcmp.ge.f32.partialorder %v2371_v37, 0.0 }
 0x1b9   : > { %vm1541_vm11 = vcmp.ge.f32.partialorder %v2373_v40, 0.0  ;;  %v1573_v43 = vmul.f32 0.01, %v2373_v40  ;;  %v1603_v44 = vsel %vm1539_vm9, %v2369_v34, %v1571_v39  ;;  %v1158_v34 = vadd.f32 %v3427_v1, %v3465_v20 }
 0x1ba   : > { %vm1542_vm12 = vcmp.ge.f32.partialorder %v2375_v42, 0.0  ;;  %v1574_v48 = vmul.f32 0.01, %v2375_v42  ;;  %v1604_v47 = vsel %vm1540_vm10, %v2371_v37, %v1572_v41  ;;  %v1164_v1 = vadd.f32 %v3431_v3, %v3465_v20 }
 0x1bb   : > { %v1605_v45 = vsel %vm1541_vm11, %v2373_v40, %v1573_v43  ;;  %v1170_v3 = vadd.f32 %v3437_v6, %v3469_v21  ;;  %v1176_v6 = vadd.f32 %v3441_v8, %v3469_v21 }
 0x1bc   : > { %v1482_v46 = vpop.f32.mrb[12].mxu0  ;;  %v1606_v49 = vsel %vm1542_vm12, %v2375_v42, %v1574_v48  ;;  %v1631_v50 = vpack.c.bf16 %v1605_v45, %v1603_v44 }
 0x1bd   : > { %v2377_v51 = vadd.f32 %v1482_v46, %v1144_v57  ;;  %v1484_v18 = vpop.f32.mrb[13].mxu0  ;;  %v1632_v22 = vpack.c.bf16 %v1606_v49, %v1604_v47  ;;  %v1168_v47 = vadd.f32 %v3435_v5, %v3465_v20  ;;  %v1174_v5 = vadd.f32 %v3439_v7, %v3465_v20 }
 0x1be   : > { %v2379_v23 = vadd.f32 %v1484_v18, %v1146_v58  ;;  %v1486_v52 = vpop.f32.mrb[14].mxu0  ;;  %v1180_v7 = vadd.f32 %v3445_v10, %v3469_v21  ;;  %v1186_v10 = vadd.f32 %v3449_v13, %v3469_v21 }
 0x1bf   : > { %v1575_v24 = vmul.f32 0.01, %v2377_v51  ;;  %v2381_v25 = vadd.f32 %v1486_v52, %v1148_v11  ;;  %v1488_v60 = vpop.f32.mrb[15].mxu0  ;;  %1898 = vmatprep.mubr.bf16.mxu1 %v1632_v22  ;;  %vm1543_vm13 = vcmp.ge.f32.partialorder %v2377_v51, 0.0 }
 0x1c0   : > { %v1576_v53 = vmul.f32 0.01, %v2379_v23  ;;  %v2383_v26 = vadd.f32 %v1488_v60, %v1150_v59  ;;  %1899 = vmatmul.mubr.bf16.gmra.mrb[40].mxu1 %v1631_v50  ;;  %vm1544_vm14 = vcmp.ge.f32.partialorder %v2379_v23, 0.0 }
 0x1c1   : > { %vm1545_vm15 = vcmp.ge.f32.partialorder %v2381_v25, 0.0  ;;  %v1577_v54 = vmul.f32 0.01, %v2381_v25  ;;  %v1607_v28 = vsel %vm1543_vm13, %v2377_v51, %v1575_v24 }
 0x1c2   : > { %vm1546_vm0 = vcmp.ge.f32.partialorder %v2383_v26, 0.0  ;;  %v1578_v27 = vmul.f32 0.01, %v2383_v26  ;;  %v1608_v31 = vsel %vm1544_vm14, %v2379_v23, %v1576_v53 }
 0x1c3   : > { %v1609_v29 = vsel %vm1545_vm15, %v2381_v25, %v1577_v54 }
 0x1c4   : > { %v1492_v30 = vpop.f32.mrb[16].mxu0  ;;  %v1610_v32 = vsel %vm1546_vm0, %v2383_v26, %v1578_v27  ;;  %v1633_v33 = vpack.c.bf16 %v1609_v29, %v1607_v28 }
 0x1c5   : > { %v2385_v35 = vadd.f32 %v1492_v30, %v1154_v61  ;;  %v1494_v36 = vpop.f32.mrb[17].mxu0  ;;  %v1634_v55 = vpack.c.bf16 %v1610_v32, %v1608_v31 }
 0x1c6   : > { %v2387_v37 = vadd.f32 %v1494_v36, %v1156_v62  ;;  %v1496_v38 = vpop.f32.mrb[18].mxu0  ;;  %v1178_v62 = vadd.f32 %v3443_v9, %v3465_v20  ;;  %v1184_v9 = vadd.f32 %v3447_v12, %v3465_v20  ;;  %v1190_v12 = vadd.f32 %v3453_v15, %v3469_v21 }
 0x1c7   : > { %v1579_v39 = vmul.f32 0.01, %v2385_v35  ;;  %v2389_v40 = vadd.f32 %v1496_v38, %v1158_v34  ;;  %v1498_v0 = vpop.f32.mrb[19].mxu0  ;;  %1908 = vmatprep.mubr.bf16.mxu1 %v1634_v55  ;;  %vm1547_vm1 = vcmp.ge.f32.partialorder %v2385_v35, 0.0 }
 0x1c8   : > { %v1580_v56 = vmul.f32 0.01, %v2387_v37  ;;  %v2391_v41 = vadd.f32 %v1498_v0, %v1160_v63  ;;  %1909 = vmatmul.mubr.bf16.gmra.mrb[44].mxu1 %v1633_v33  ;;  %vm1548_vm2 = vcmp.ge.f32.partialorder %v2387_v37, 0.0 }
 0x1c9   : > { %vm1549_vm3 = vcmp.ge.f32.partialorder %v2389_v40, 0.0  ;;  %v1581_v42 = vmul.f32 0.01, %v2389_v40  ;;  %v1611_v57 = vsel %vm1547_vm1, %v2385_v35, %v1579_v39 }
 0x1ca   : > { %vm1550_vm4 = vcmp.ge.f32.partialorder %v2391_v41, 0.0  ;;  %v1582_v43 = vmul.f32 0.01, %v2391_v41  ;;  %v1612_v44 = vsel %vm1548_vm2, %v2387_v37, %v1580_v56 }
 0x1cb   : > { %v1613_v48 = vsel %vm1549_vm3, %v2389_v40, %v1581_v42 }
 0x1cc   : > { %v1502_v58 = vpop.f32.mrb[20].mxu0  ;;  %v1614_v45 = vsel %vm1550_vm4, %v2391_v41, %v1582_v43  ;;  %v1635_v46 = vpack.c.bf16 %v1613_v48, %v1611_v57  ;;  %v1188_v41 = vadd.f32 %v3451_v14, %v3465_v20 }
 0x1cd   : > { %v2393_v49 = vadd.f32 %v1502_v58, %v1164_v1  ;;  %v1504_v50 = vpop.f32.mrb[21].mxu0  ;;  %v1636_v11 = vpack.c.bf16 %v1614_v45, %v1612_v44 }
 0x1ce   : > { %v2395_v51 = vadd.f32 %v1504_v50, %v1166_v2  ;;  %v1506_v18 = vpop.f32.mrb[22].mxu0 }
 0x1cf   : > { %v1583_v22 = vmul.f32 0.01, %v2393_v49  ;;  %v2397_v59 = vadd.f32 %v1506_v18, %v1168_v47  ;;  %v1508_v4 = vpop.f32.mrb[23].mxu0  ;;  %1918 = vmatprep.mubr.bf16.mxu1 %v1636_v11  ;;  %vm1551_vm5 = vcmp.ge.f32.partialorder %v2393_v49, 0.0  ;;  %v3531_v11 = vld [vmem:[%s3632_s5] sm:$0xff] }
 0x1d0   : > { %v1584_v23 = vmul.f32 0.01, %v2395_v51  ;;  %v2399_v52 = vadd.f32 %v1508_v4, %v1170_v3  ;;  %1919 = vmatmul.mubr.bf16.gmra.mrb[48].mxu1 %v1635_v46  ;;  %vm1552_vm6 = vcmp.ge.f32.partialorder %v2395_v51, 0.0  ;;  %v2348_v3 = vcombine.high %v3531_v11, %v3531_v11  ;;  %v453_v18 = vld [vmem:[%s3631_s4] sm:$0x3] }
 0x1d1   : > { %vm1553_vm7 = vcmp.ge.f32.partialorder %v2397_v59, 0.0  ;;  %v1585_v24 = vmul.f32 0.01, %v2397_v59  ;;  %v1615_v60 = vsel %vm1551_vm5, %v2393_v49, %v1583_v22  ;;  %v3539_v22 = vrot.slane %v453_v18, %v3458_v17 }
 0x1d2   : > { %vm1554_vm8 = vcmp.ge.f32.partialorder %v2399_v52, 0.0  ;;  %v1586_v25 = vmul.f32 0.01, %v2399_v52  ;;  %v1616_v54 = vsel %vm1552_vm6, %v2395_v51, %v1584_v23  ;;  %v454_v51 = vld [vmem:[#allocation2] sm:$0x1] }
 0x1d3   : > { %v1617_v53 = vsel %vm1553_vm7, %v2397_v59, %v1585_v24  ;;  %2121 = vperm.xlu0 %2521, %v454_v51   ;;  %v3543_v59 = vrot.slane %v453_v18, %v560_v19 }
 0x1d4   : > { %v1512_v26 = vpop.f32.mrb[24].mxu0  ;;  %v1618_v61 = vsel %vm1554_vm8, %v2399_v52, %v1586_v25  ;;  %v1637_v27 = vpack.c.bf16 %v1617_v53, %v1615_v60 }
 0x1d5   : > { %v2401_v28 = vadd.f32 %v1512_v26, %v1174_v5  ;;  %v1514_v29 = vpop.f32.mrb[25].mxu0  ;;  %v1638_v30 = vpack.c.bf16 %v1618_v61, %v1616_v54 }
 0x1d6   : > { %v2403_v31 = vadd.f32 %v1514_v29, %v1176_v6  ;;  %v1516_v32 = vpop.f32.mrb[26].mxu0 }
 0x1d7   : > { %v1587_v33 = vmul.f32 0.01, %v2401_v28  ;;  %v2405_v34 = vadd.f32 %v1516_v32, %v1178_v62  ;;  %v1518_v8 = vpop.f32.mrb[27].mxu0  ;;  %1928 = vmatprep.mubr.bf16.mxu1 %v1638_v30  ;;  %vm1555_vm9 = vcmp.ge.f32.partialorder %v2401_v28, 0.0 }
 0x1d8   : > { %v1588_v35 = vmul.f32 0.01, %v2403_v31  ;;  %v2407_v36 = vadd.f32 %v1518_v8, %v1180_v7  ;;  %1929 = vmatmul.mubr.bf16.gmra.mrb[52].mxu1 %v1637_v27  ;;  %vm1556_vm10 = vcmp.ge.f32.partialorder %v2403_v31, 0.0 }
 0x1d9   : > { %vm1557_vm11 = vcmp.ge.f32.partialorder %v2405_v34, 0.0  ;;  %v1589_v55 = vmul.f32 0.01, %v2405_v34  ;;  %v1619_v37 = vsel %vm1555_vm9, %v2401_v28, %v1587_v33 }
 0x1da   : > { %vm1558_vm12 = vcmp.ge.f32.partialorder %v2407_v36, 0.0  ;;  %v1590_v63 = vmul.f32 0.01, %v2407_v36  ;;  %v1620_v40 = vsel %vm1556_vm10, %v2403_v31, %v1588_v35 }
 0x1db   : > { %v1621_v38 = vsel %vm1557_vm11, %v2405_v34, %v1589_v55 }
 0x1dc   : > { %v1522_v39 = vpop.f32.mrb[28].mxu0  ;;  %v1622_v0 = vsel %vm1558_vm12, %v2407_v36, %v1590_v63  ;;  %v1639_v56 = vpack.c.bf16 %v1621_v38, %v1619_v37 }
 0x1dd   : > { %v2409_v42 = vadd.f32 %v1522_v39, %v1184_v9  ;;  %v1524_v1 = vpop.f32.mrb[29].mxu0  ;;  %v1640_v43 = vpack.c.bf16 %v1622_v0, %v1620_v40 }
 0x1de   : > { %v2411_v2 = vadd.f32 %v1524_v1, %v1186_v10  ;;  %v1526_v57 = vpop.f32.mrb[30].mxu0 }
 0x1df   : > { %v1591_v48 = vmul.f32 0.01, %v2409_v42  ;;  %v2413_v58 = vadd.f32 %v1526_v57, %v1188_v41  ;;  %v1528_v13 = vpop.f32.mrb[31].mxu0  ;;  %1938 = vmatprep.mubr.bf16.mxu1 %v1640_v43  ;;  %vm1559_vm13 = vcmp.ge.f32.partialorder %v2409_v42, 0.0 }
 0x1e0   : > { %v1592_v44 = vmul.f32 0.01, %v2411_v2  ;;  %v2415_v45 = vadd.f32 %v1528_v13, %v1190_v12  ;;  %1939 = vmatmul.mubr.bf16.gmra.mrb[56].mxu1 %v1639_v56  ;;  %vm1560_vm14 = vcmp.ge.f32.partialorder %v2411_v2, 0.0 }
 0x1e1   : > { %vm1561_vm15 = vcmp.ge.f32.partialorder %v2413_v58, 0.0  ;;  %v1593_v46 = vmul.f32 0.01, %v2413_v58  ;;  %v1623_v20 = vsel %vm1559_vm13, %v2409_v42, %v1591_v48 }
 0x1e2   : > { %vm1562_vm0 = vcmp.ge.f32.partialorder %v2415_v45, 0.0  ;;  %v1594_v14 = vmul.f32 0.01, %v2415_v45  ;;  %v1624_v49 = vsel %vm1560_vm14, %v2411_v2, %v1592_v44 }
 0x1e3   : > { %v1625_v47 = vsel %vm1561_vm15, %v2413_v58, %v1593_v46 }
 0x1e4   : > { %v1626_v50 = vsel %vm1562_vm0, %v2415_v45, %v1594_v14  ;;  %v1641_v15 = vpack.c.bf16 %v1625_v47, %v1623_v20 }
 0x1e5   : > { %v1642_v21 = vpack.c.bf16 %v1626_v50, %v1624_v49 }
 0x1e7   : > { %1948 = vmatprep.mubr.bf16.mxu1 %v1642_v21 }
 0x1e8   : > { %1949 = vmatmul.mubr.bf16.gmra.mrb[60].mxu1 %v1641_v15 }
 0x1e9   : > { %2111 = vmatprep.mubr.bf16.mxu1 %v2348_v3 }
 0x283   : > { %v1880_v4 = vpop.f32.mrb[32].mxu1 }
 0x284   : > { %v1881_v23 = vadd.f32 %v1880_v4, %v3539_v22  ;;  %v1882_v52 = vpop.f32.mrb[33].mxu1 }
 0x285   : > { %v1883_v24 = vadd.f32 %v1882_v52, %v3543_v59  ;;  %v1884_v5 = vpop.f32.mrb[34].mxu1 }
 0x286   : > { %v1991_v25 = vmul.f32 0.01, %v1881_v23  ;;  %v1885_v6 = vadd.f32 %v1884_v5, %v3539_v22  ;;  %v1886_v60 = vpop.f32.mrb[35].mxu1  ;;  %vm1959_vm1 = vcmp.ge.f32.partialorder %v1881_v23, 0.0 }
 0x287   : > { %v1992_v53 = vmul.f32 0.01, %v1883_v24  ;;  %v1887_v26 = vadd.f32 %v1886_v60, %v3543_v59  ;;  %vm1960_vm2 = vcmp.ge.f32.partialorder %v1883_v24, 0.0 }
 0x288   : > { %vm1961_vm3 = vcmp.ge.f32.partialorder %v1885_v6, 0.0  ;;  %v1993_v16 = vmul.f32 0.01, %v1885_v6  ;;  %v2023_v54 = vsel %vm1959_vm1, %v1881_v23, %v1991_v25 }
 0x289   : > { %vm1962_vm4 = vcmp.ge.f32.partialorder %v1887_v26, 0.0  ;;  %v1994_v19 = vmul.f32 0.01, %v1887_v26  ;;  %v2024_v28 = vsel %vm1960_vm2, %v1883_v24, %v1992_v53 }
 0x28a   : > { %v2025_v61 = vsel %vm1961_vm3, %v1885_v6, %v1993_v16 }
 0x28b   : > { %v2056_v27 = vpack.c.bf16 %v2025_v61, %v2023_v54  ;;  %v1890_v62 = vpop.f32.mrb[36].mxu1  ;;  %v2026_v29 = vsel %vm1962_vm4, %v1887_v26, %v1994_v19 }
 0x28c   : > { %v1891_v30 = vadd.f32 %v1890_v62, %v3539_v22  ;;  %v1892_v7 = vpop.f32.mrb[37].mxu1  ;;  %v2057_v31 = vpack.c.bf16 %v2026_v29, %v2024_v28 }
 0x28d   : > { %v1893_v32 = vadd.f32 %v1892_v7, %v3543_v59  ;;  %v1894_v33 = vpop.f32.mrb[38].mxu1 }
 0x28e   : > { %v1995_v34 = vmul.f32 0.01, %v1891_v30  ;;  %v1895_v8 = vadd.f32 %v1894_v33, %v3539_v22  ;;  %v1896_v35 = vpop.f32.mrb[39].mxu1  ;;  %2079 = vmatprep.subr.bf16.mxu1 %v2057_v31  ;;  %vm1963_vm5 = vcmp.ge.f32.partialorder %v1891_v30, 0.0 }
 0x28f   : > { %v1996_v36 = vmul.f32 0.01, %v1893_v32  ;;  %v1897_v55 = vadd.f32 %v1896_v35, %v3543_v59  ;;  %2080 = vmatpush1.bf16.xpose.msra.mxu1 %v2056_v27  ;;  %vm1964_vm6 = vcmp.ge.f32.partialorder %v1893_v32, 0.0 }
 0x290   : > { %vm1965_vm7 = vcmp.ge.f32.partialorder %v1895_v8, 0.0  ;;  %v1997_v9 = vmul.f32 0.01, %v1895_v8  ;;  %v2027_v10 = vsel %vm1963_vm5, %v1891_v30, %v1995_v34 }
 0x291   : > { %vm1966_vm8 = vcmp.ge.f32.partialorder %v1897_v55, 0.0  ;;  %v1998_v63 = vmul.f32 0.01, %v1897_v55  ;;  %v2028_v40 = vsel %vm1964_vm6, %v1893_v32, %v1996_v36 }
 0x292   : > { %v2029_v37 = vsel %vm1965_vm7, %v1895_v8, %v1997_v9 }
 0x293   : > { %v2058_v38 = vpack.c.bf16 %v2029_v37, %v2027_v10  ;;  %v1900_v39 = vpop.f32.mrb[40].mxu1  ;;  %v2030_v0 = vsel %vm1966_vm8, %v1897_v55, %v1998_v63 }
 0x294   : > { %v1901_v56 = vadd.f32 %v1900_v39, %v3539_v22  ;;  %v1902_v41 = vpop.f32.mrb[41].mxu1  ;;  %v2059_v42 = vpack.c.bf16 %v2030_v0, %v2028_v40 }
 0x295   : > { %v1903_v1 = vadd.f32 %v1902_v41, %v3543_v59  ;;  %v1904_v43 = vpop.f32.mrb[42].mxu1 }
 0x296   : > { %v1999_v12 = vmul.f32 0.01, %v1901_v56  ;;  %v1905_v2 = vadd.f32 %v1904_v43, %v3539_v22  ;;  %v1906_v57 = vpop.f32.mrb[43].mxu1  ;;  %2081 = vmatprep.subr.bf16.mxu1 %v2059_v42  ;;  %vm1967_vm9 = vcmp.ge.f32.partialorder %v1901_v56, 0.0 }
 0x297   : > { %v2000_v48 = vmul.f32 0.01, %v1903_v1  ;;  %v1907_v58 = vadd.f32 %v1906_v57, %v3543_v59  ;;  %2082 = vmatpush1.bf16.xpose.msra.mxu1 %v2058_v38  ;;  %vm1968_vm10 = vcmp.ge.f32.partialorder %v1903_v1, 0.0 }
 0x298   : > { %vm1969_vm11 = vcmp.ge.f32.partialorder %v1905_v2, 0.0  ;;  %v2001_v13 = vmul.f32 0.01, %v1905_v2  ;;  %v2031_v45 = vsel %vm1967_vm9, %v1901_v56, %v1999_v12 }
 0x299   : > { %vm1970_vm12 = vcmp.ge.f32.partialorder %v1907_v58, 0.0  ;;  %v2002_v44 = vmul.f32 0.01, %v1907_v58  ;;  %v2032_v47 = vsel %vm1968_vm10, %v1903_v1, %v2000_v48 }
 0x29a   : > { %v2033_v46 = vsel %vm1969_vm11, %v1905_v2, %v2001_v13 }
 0x29b   : > { %v2060_v14 = vpack.c.bf16 %v2033_v46, %v2031_v45  ;;  %v1910_v20 = vpop.f32.mrb[44].mxu1  ;;  %v2034_v49 = vsel %vm1970_vm12, %v1907_v58, %v2002_v44 }
 0x29c   : > { %v1911_v50 = vadd.f32 %v1910_v20, %v3539_v22  ;;  %v1912_v15 = vpop.f32.mrb[45].mxu1  ;;  %v2061_v21 = vpack.c.bf16 %v2034_v49, %v2032_v47 }
 0x29d   : > { %v1913_v3 = vadd.f32 %v1912_v15, %v3543_v59  ;;  %v1914_v51 = vpop.f32.mrb[46].mxu1 }
 0x29e   : > { %v2003_v18 = vmul.f32 0.01, %v1911_v50  ;;  %v1915_v4 = vadd.f32 %v1914_v51, %v3539_v22  ;;  %v1916_v23 = vpop.f32.mrb[47].mxu1  ;;  %2083 = vmatprep.subr.bf16.mxu1 %v2061_v21  ;;  %vm1971_vm13 = vcmp.ge.f32.partialorder %v1911_v50, 0.0 }
 0x29f   : > { %v2004_v52 = vmul.f32 0.01, %v1913_v3  ;;  %v1917_v24 = vadd.f32 %v1916_v23, %v3543_v59  ;;  %2084 = vmatpush1.bf16.xpose.msra.mxu1 %v2060_v14  ;;  %vm1972_vm14 = vcmp.ge.f32.partialorder %v1913_v3, 0.0 }
 0x2a0   : > { %vm1973_vm15 = vcmp.ge.f32.partialorder %v1915_v4, 0.0  ;;  %v2005_v5 = vmul.f32 0.01, %v1915_v4  ;;  %v2035_v6 = vsel %vm1971_vm13, %v1911_v50, %v2003_v18 }
 0x2a1   : > { %vm1974_vm0 = vcmp.ge.f32.partialorder %v1917_v24, 0.0  ;;  %v2006_v25 = vmul.f32 0.01, %v1917_v24  ;;  %v2036_v16 = vsel %vm1972_vm14, %v1913_v3, %v2004_v52 }
 0x2a2   : > { %v2037_v60 = vsel %vm1973_vm15, %v1915_v4, %v2005_v5 }
 0x2a3   : > { %v2062_v53 = vpack.c.bf16 %v2037_v60, %v2035_v6  ;;  %v1920_v26 = vpop.f32.mrb[48].mxu1  ;;  %v2038_v19 = vsel %vm1974_vm0, %v1917_v24, %v2006_v25 }
 0x2a4   : > { %v1921_v54 = vadd.f32 %v1920_v26, %v3539_v22  ;;  %v1922_v61 = vpop.f32.mrb[49].mxu1  ;;  %v2063_v27 = vpack.c.bf16 %v2038_v19, %v2036_v16 }
 0x2a5   : > { %v1923_v62 = vadd.f32 %v1922_v61, %v3543_v59  ;;  %v1924_v28 = vpop.f32.mrb[50].mxu1 }
 0x2a6   : > { %v2007_v29 = vmul.f32 0.01, %v1921_v54  ;;  %v1925_v30 = vadd.f32 %v1924_v28, %v3539_v22  ;;  %v1926_v7 = vpop.f32.mrb[51].mxu1  ;;  %2085 = vmatprep.subr.bf16.mxu1 %v2063_v27  ;;  %vm1975_vm1 = vcmp.ge.f32.partialorder %v1921_v54, 0.0 }
 0x2a7   : > { %v2008_v31 = vmul.f32 0.01, %v1923_v62  ;;  %v1927_v32 = vadd.f32 %v1926_v7, %v3543_v59  ;;  %2086 = vmatpush1.bf16.xpose.msra.mxu1 %v2062_v53  ;;  %vm1976_vm2 = vcmp.ge.f32.partialorder %v1923_v62, 0.0 }
 0x2a8   : > { %vm1977_vm3 = vcmp.ge.f32.partialorder %v1925_v30, 0.0  ;;  %v2009_v33 = vmul.f32 0.01, %v1925_v30  ;;  %v2039_v8 = vsel %vm1975_vm1, %v1921_v54, %v2007_v29 }
 0x2a9   : > { %vm1978_vm4 = vcmp.ge.f32.partialorder %v1927_v32, 0.0  ;;  %v2010_v34 = vmul.f32 0.01, %v1927_v32  ;;  %v2040_v9 = vsel %vm1976_vm2, %v1923_v62, %v2008_v31 }
 0x2aa   : > { %v2041_v35 = vsel %vm1977_vm3, %v1925_v30, %v2009_v33 }
 0x2ab   : > { %v2064_v36 = vpack.c.bf16 %v2041_v35, %v2039_v8  ;;  %v1930_v55 = vpop.f32.mrb[52].mxu1  ;;  %v2042_v63 = vsel %vm1978_vm4, %v1927_v32, %v2010_v34 }
 0x2ac   : > { %v1931_v10 = vadd.f32 %v1930_v55, %v3539_v22  ;;  %v1932_v37 = vpop.f32.mrb[53].mxu1  ;;  %v2065_v38 = vpack.c.bf16 %v2042_v63, %v2040_v9 }
 0x2ad   : > { %v1933_v39 = vadd.f32 %v1932_v37, %v3543_v59  ;;  %v1934_v40 = vpop.f32.mrb[54].mxu1 }
 0x2ae   : > { %v2011_v0 = vmul.f32 0.01, %v1931_v10  ;;  %v1935_v56 = vadd.f32 %v1934_v40, %v3539_v22  ;;  %v1936_v41 = vpop.f32.mrb[55].mxu1  ;;  %2087 = vmatprep.subr.bf16.mxu1 %v2065_v38  ;;  %vm1979_vm5 = vcmp.ge.f32.partialorder %v1931_v10, 0.0 }
 0x2af   : > { %v2012_v42 = vmul.f32 0.01, %v1933_v39  ;;  %v1937_v1 = vadd.f32 %v1936_v41, %v3543_v59  ;;  %2088 = vmatpush1.bf16.xpose.msra.mxu1 %v2064_v36  ;;  %vm1980_vm6 = vcmp.ge.f32.partialorder %v1933_v39, 0.0 }
 0x2b0   : > { %vm1981_vm7 = vcmp.ge.f32.partialorder %v1935_v56, 0.0  ;;  %v2013_v43 = vmul.f32 0.01, %v1935_v56  ;;  %v2043_v2 = vsel %vm1979_vm5, %v1931_v10, %v2011_v0 }
 0x2b1   : > { %vm1982_vm8 = vcmp.ge.f32.partialorder %v1937_v1, 0.0  ;;  %v2014_v12 = vmul.f32 0.01, %v1937_v1  ;;  %v2044_v13 = vsel %vm1980_vm6, %v1933_v39, %v2012_v42 }
 0x2b2   : > { %v2045_v57 = vsel %vm1981_vm7, %v1935_v56, %v2013_v43 }
 0x2b3   : > { %v2066_v48 = vpack.c.bf16 %v2045_v57, %v2043_v2  ;;  %v1940_v58 = vpop.f32.mrb[56].mxu1  ;;  %v2046_v44 = vsel %vm1982_vm8, %v1937_v1, %v2014_v12 }
 0x2b4   : > { %v1941_v45 = vadd.f32 %v1940_v58, %v3539_v22  ;;  %v1942_v46 = vpop.f32.mrb[57].mxu1  ;;  %v2067_v14 = vpack.c.bf16 %v2046_v44, %v2044_v13 }
 0x2b5   : > { %v1943_v20 = vadd.f32 %v1942_v46, %v3543_v59  ;;  %v1944_v47 = vpop.f32.mrb[58].mxu1 }
 0x2b6   : > { %v2015_v49 = vmul.f32 0.01, %v1941_v45  ;;  %v1945_v50 = vadd.f32 %v1944_v47, %v3539_v22  ;;  %v1946_v15 = vpop.f32.mrb[59].mxu1  ;;  %2089 = vmatprep.subr.bf16.mxu1 %v2067_v14  ;;  %vm1983_vm9 = vcmp.ge.f32.partialorder %v1941_v45, 0.0 }
 0x2b7   : > { %v2016_v21 = vmul.f32 0.01, %v1943_v20  ;;  %v1947_v3 = vadd.f32 %v1946_v15, %v3543_v59  ;;  %2090 = vmatpush1.bf16.xpose.msra.mxu1 %v2066_v48  ;;  %vm1984_vm10 = vcmp.ge.f32.partialorder %v1943_v20, 0.0 }
 0x2b8   : > { %vm1985_vm11 = vcmp.ge.f32.partialorder %v1945_v50, 0.0  ;;  %v2017_v51 = vmul.f32 0.01, %v1945_v50  ;;  %v2047_v4 = vsel %vm1983_vm9, %v1941_v45, %v2015_v49 }
 0x2b9   : > { %vm1986_vm12 = vcmp.ge.f32.partialorder %v1947_v3, 0.0  ;;  %v2018_v18 = vmul.f32 0.01, %v1947_v3  ;;  %v2048_v5 = vsel %vm1984_vm10, %v1943_v20, %v2016_v21 }
 0x2ba   : > { %v2049_v23 = vsel %vm1985_vm11, %v1945_v50, %v2017_v51 }
 0x2bb   : > { %v2068_v52 = vpack.c.bf16 %v2049_v23, %v2047_v4  ;;  %v1950_v24 = vpop.f32.mrb[60].mxu1  ;;  %v2050_v25 = vsel %vm1986_vm12, %v1947_v3, %v2018_v18 }
 0x2bc   : > { %v1951_v6 = vadd.f32 %v1950_v24, %v3539_v22  ;;  %v1952_v60 = vpop.f32.mrb[61].mxu1  ;;  %v2069_v53 = vpack.c.bf16 %v2050_v25, %v2048_v5 }
 0x2bd   : > { %v1953_v26 = vadd.f32 %v1952_v60, %v3543_v59  ;;  %v1954_v16 = vpop.f32.mrb[62].mxu1 }
 0x2be   : > { %v2019_v19 = vmul.f32 0.01, %v1951_v6  ;;  %v1955_v54 = vadd.f32 %v1954_v16, %v3539_v22  ;;  %v1956_v61 = vpop.f32.mrb[63].mxu1  ;;  %2091 = vmatprep.subr.bf16.mxu1 %v2069_v53  ;;  %vm1987_vm13 = vcmp.ge.f32.partialorder %v1951_v6, 0.0  ;;  %v2347_v22 = vcombine.low %v3531_v11, %v3531_v11 }
 0x2bf   : > { %v2020_v27 = vmul.f32 0.01, %v1953_v26  ;;  %v1957_v62 = vadd.f32 %v1956_v61, %v3543_v59  ;;  %2092 = vmatpush1.bf16.xpose.msra.mxu1 %v2068_v52  ;;  %vm1988_vm14 = vcmp.ge.f32.partialorder %v1953_v26, 0.0  ;;  %v2122_v59 = vpop.permute.xlu0 %2121 }
 0x2c0   : > { %vm1989_vm15 = vcmp.ge.f32.partialorder %v1955_v54, 0.0  ;;  %v2021_v28 = vmul.f32 0.01, %v1955_v54  ;;  %v2051_v30 = vsel %vm1987_vm13, %v1951_v6, %v2019_v19  ;;  %v2127_v8 = vrot.slane %v2122_v59, %v3458_v17 }
 0x2c1   : > { %vm1990_vm0 = vcmp.ge.f32.partialorder %v1957_v62, 0.0  ;;  %v2022_v29 = vmul.f32 0.01, %v1957_v62  ;;  %v2052_v32 = vsel %vm1988_vm14, %v1953_v26, %v2020_v27 }
 0x2c2   : > { %v2053_v7 = vsel %vm1989_vm15, %v1955_v54, %v2021_v28 }
 0x2c3   : > { %v2070_v31 = vpack.c.bf16 %v2053_v7, %v2051_v30  ;;  %v2054_v33 = vsel %vm1990_vm0, %v1957_v62, %v2022_v29 }
 0x2c4   : > { %v2071_v34 = vpack.c.bf16 %v2054_v33, %v2052_v32 }
 0x2c6   : > { %2093 = vmatprep.subr.bf16.mxu1 %v2071_v34 }
 0x2c7   : > { %2094 = vmatpush1.bf16.xpose.msra.mxu1 %v2070_v31 }
 0x2ce   : > { %2112 = vmatmul.mubr.bf16.vlgmr.msra.gmra.mrb[64].mxu1 %v2347_v22 }
 0x3a1   : > { %v2113_v35 = vpop.f32.mrb[64].mxu1 }
 0x3a2   : > { %v2128_v36 = vadd.f32 %v2127_v8, %v2113_v35  ;;  %v2115_v55 = vpop.f32.mrb[65].mxu1 }
 0x3a3   : > { %v2116_v9 = vpop.f32.mrb[66].mxu1 }
 0x3a4   : > { %v2129_v63 = vsub.f32 0.0, %v2128_v36  ;;  %v2117_v10 = vpop.f32.mrb[67].mxu1 }
 0x3a6   : > { %v2130_v37 = vmul.f32 1.442695, %v2129_v63 }
 0x3a8   : > { %2719 = vpow2.f32 %v2130_v37 }
 0x3b2   : > { %v2720_v38 = vpop.eup %2719 }
 0x3b3   : > { %v2132_v39 = vadd.f32 1.0, %v2720_v38 }
 0x3b5   : > { %2721 = vrcp.f32 %v2132_v39 }
 0x3bf   : > { %v2722_v17 = vpop.eup %2721 }
 0x3c0   : > { %2134 = vst [vmem:[%s275_s17] sm:$0x1] %v2722_v17 }
 0x3c1   : > { %2736 = shalt.err (!%p2733_p3)
}
 0x3c2   : > { %s2737_s22 = scalar_lea.hbm %s3585_s30, 16  ;;  %s2741_s14 = scalar_lea.hbm %s3634_s7, 32 }
 0x3c3   : > { %p2738_p4 = scmp.ne.s32.totalorder %s3585_s30, %s2737_s22  ;;  %p2742_p9 = scmp.lt.u32.totalorder %s3585_s30, %s3634_s7 }
 0x3c4   : > { %p2743_p10 = scmp.lt.u32.totalorder %s2741_s14, %s2737_s22  ;;  %p2745_p12 = scmp.lt.u32.totalorder %s2737_s22, %s3585_s30 }
 0x3c5   : > { %p2739_p7 = pnand %p2738_p4, %p2867_p5 }
 0x3c6   : > { %p2744_p11 = por %p2743_p10, %p2742_p9 }
 0x3c7   : > { %p2740_p8 = pneg %p2739_p7 }
 0x3c8   : > { %p2746_p13 = por %p2745_p12, %p2744_p11 }
 0x3ca   : > { %p2747_p0 = pnand %p2746_p13, %p2740_p8 }
 0x3cc   : > { %2750 = shalt.err (!%p2747_p0)
}
 0x3cd   : > { %2481 = dma.vmem_to_hbm [thread:$0]  (%p2867_p5), %s3587_s18, 16, %s3585_s30, %s2136_s21  }
 0x3ce PF: > { %p2487_p1 = scmp.ge.s32.totalorder %s2785_s29, 2  ;;  %s2160_s17 = sand.u32 1, %s2773_s26  }
 0x3cf   : > { %s2161_s19 = scalar_lea.sflag [#allocation4], %s2160_s17 }
 0x3d0   : > { %p2484_p2 = pnand %p2487_p1, %p2871_p6 }
 0x3d2   : > { %2768 = dma.done.wait (!%p2484_p2), %s2161_s19, 16  }
 0x3d3   : > { %2770 = vsyncadd (!%p2484_p2), %s2161_s19, 4294967280  ;;  %p19_p3 = scmp.ge.s32.totalorder %s2855_s8, 4   ;;  %s3637_s26 = smov %s2777_s27 }
 0x3d4   : > { %s3638_s27 = smov %s2781_s28  ;;  %s3639_s28 = smov %s2865_s11 }
 0x3d5   : > { %s3640_s29 = smov %s2855_s8  ;;  %21 = sbr.rel (!%p19_p3) target bundleno = 6 (0x6), region = 83 }
 0x3dc   :  { %2165 = vsyncpa [#allocation4], 1 }
 0x3dd   :  { %2167 = vsyncpa [#allocation4 + $0x1], 1 }

</bundles_post_ra>
